<compile_context>
chip_gen: v7x
topology: tpu7x:2x2x1
jax: 0.10.0
libtpu: 0.0.40
codegen_flags: <defaults>
</compile_context>

<pallas_src>
import functools

import jax
import jax.numpy as jnp
from jax.experimental import pallas as pl
from jax.experimental.pallas import tpu as pltpu


def _rep_highlight_kernel(h_ref, kv_ref, ln_w_ref, wq_ref, wkv_ref, wo_ref, *rest,
                          n_heads, d_kv, eps, gate_control, cache_kv,
                          approx_recip, exp_dtype, transpose_k):
    if gate_control:
        w12_ref, out_ref, k_ref, v_ref, ctx_ref = rest
    else:
        out_ref, k_ref, v_ref, ctx_ref = rest

    HK = n_heads * d_kv
    cd = wq_ref.dtype                        # MXU operand dtype (f32 or bf16)

    # ---- fused [K|V] projection into persistent VMEM caches (once per batch row) ----
    def project_kv():
        kv_c = kv_ref[0].astype(cd)                                   # (Skv, D)
        kvp = jnp.dot(kv_c, wkv_ref[...],
                      preferred_element_type=jnp.float32)             # (Skv, 2*HK)
        k_part = kvp[:, :HK]
        if transpose_k:
            # cache K already transposed -> no per-head relayout in the score matmul
            k_ref[...] = k_part.T.astype(k_ref.dtype)                 # (HK, Skv)
        else:
            k_ref[...] = k_part.astype(k_ref.dtype)                   # (Skv, HK)
        v_ref[...] = kvp[:, HK:].astype(v_ref.dtype)                  # (Skv, HK)

    if cache_kv:
        @pl.when(pl.program_id(1) == 0)
        def _():
            project_kv()
    else:
        project_kv()

    # ---- T5LayerNorm (RMS norm) on the query-side hidden states, f32 stats ----
    h = h_ref[0].astype(jnp.float32)                                  # (tq, D)
    var = jnp.mean(h * h, axis=-1, keepdims=True)
    normed = (h * jax.lax.rsqrt(var + eps)) * ln_w_ref[...].astype(jnp.float32)

    # ---- fused Q projection (N = H*dk) ----
    q = jnp.dot(normed.astype(cd), wq_ref[...],
                preferred_element_type=jnp.float32)                   # (tq, HK)

    # ---- per-head attention core (no score scaling / mask / bias in T5 cross-attn) ----
    for hd in range(n_heads):
        lo, hi = hd * d_kv, (hd + 1) * d_kv
        qh = q[:, lo:hi].astype(cd)                                   # (tq, dk)
        if transpose_k:
            s = jnp.dot(qh, k_ref[lo:hi, :],
                        preferred_element_type=jnp.float32)           # (tq, Skv)
        else:
            s = jax.lax.dot_general(qh, k_ref[:, lo:hi],
                                    (((1,), (1,)), ((), ())),
                                    preferred_element_type=jnp.float32)
        m = jnp.max(s, axis=-1, keepdims=True)
        z = s - m
        if exp_dtype is not None:             # optional bf16 exp on bf16-EUP chips
            z = z.astype(exp_dtype)
        p = jnp.exp(z)                                                # unnormalized
        denom = jnp.sum(p.astype(jnp.float32), axis=-1, keepdims=True)
        ctx = jnp.dot(p.astype(cd), v_ref[:, lo:hi],
                      preferred_element_type=jnp.float32)             # (tq, dk)
        inv = pl.reciprocal(denom, approx=True) if approx_recip else 1.0 / denom
        ctx_ref[:, lo:hi] = (ctx * inv).astype(ctx_ref.dtype)         # deferred softmax norm

    # ---- single fused output projection (K = H*dk) ----
    attn_out = jnp.dot(ctx_ref[...], wo_ref[...],
                       preferred_element_type=jnp.float32)            # (tq, D)

    # dropout is identity in eval mode.
    if gate_control:
        # GatedControl fused: gate = sigmoid([x|y] @ [[w1],[w2]]); o = g*x + (1-g)*y
        xy = jnp.concatenate([h, attn_out], axis=-1).astype(cd)       # (tq, 2D)
        gate = jax.nn.sigmoid(jnp.dot(xy, w12_ref[...],
                                      preferred_element_type=jnp.float32))
        out = gate * h + (1.0 - gate) * attn_out
    else:
        out = h + attn_out

    out_ref[0] = out.astype(out_ref.dtype)


def _pick_q_block(sq, skv):
    # v7x guidance: smaller q tiles when the kv sequence (and K/V caches) are large.
    prefs = (128, 256, 512) if skv >= 2048 else (256, 512, 128)
    for cand in prefs:
        if sq % cand == 0:
            return cand
    return sq


def _default_vmem_limit():
    # ~100 MiB on 128-MiB-VMEM chips (v5e/v6e), ~51 MiB on 64-MiB v7x.
    try:
        cap = int(pltpu.get_tpu_info().vmem_capacity_bytes)
        return max(32 << 20, min(int(cap * 0.8), 100 << 20))
    except Exception:
        return 48 << 20


def _build_call(*, B, Sq, Skv, D, HK, n_q, q_block, out_dtype, cd, n_heads, d_kv,
                eps, gate_control, cache_kv, approx_recip, exp_dtype, dims,
                vmem_limit, transpose_k, single_buffer, cost_estimate):
    kernel = functools.partial(
        _rep_highlight_kernel, n_heads=n_heads, d_kv=d_kv, eps=eps,
        gate_control=gate_control, cache_kv=cache_kv, approx_recip=approx_recip,
        exp_dtype=exp_dtype, transpose_k=transpose_k)

    def const_spec(shape):
        imap = lambda b, qi, _s=shape: tuple(0 for _ in _s)
        if single_buffer:
            # constant blocks never change -> one buffer is enough (halves weight VMEM)
            return pl.BlockSpec(shape, imap, pipeline_mode=pl.Buffered(1))
        return pl.BlockSpec(shape, imap)

    in_specs = [
        pl.BlockSpec((1, q_block, D), lambda b, qi: (b, qi, 0)),   # hidden_states tile
        pl.BlockSpec((1, Skv, D), lambda b, qi: (b, 0, 0)),        # key_value_states
        const_spec((1, D)),                                        # RMS-norm weight
        const_spec((D, HK)),                                       # wq
        const_spec((D, 2 * HK)),                                   # fused [wk|wv]
        const_spec((HK, D)),                                       # wo
    ]
    if gate_control:
        in_specs.append(const_spec((2 * D, D)))                    # stacked [w1;w2]

    k_shape = (HK, Skv) if transpose_k else (Skv, HK)
    scratch_shapes = [
        pltpu.VMEM(k_shape, cd),          # K (transposed) cache, persists across q tiles
        pltpu.VMEM((Skv, HK), cd),        # V cache
        pltpu.VMEM((q_block, HK), cd),    # per-tile context (heads written in place)
    ]

    return pl.pallas_call(
        kernel,
        out_shape=jax.ShapeDtypeStruct((B, Sq, D), out_dtype),
        grid_spec=pltpu.PrefetchScalarGridSpec(
            num_scalar_prefetch=0,
            grid=(B, n_q),
            in_specs=in_specs,
            out_specs=pl.BlockSpec((1, q_block, D), lambda b, qi: (b, qi, 0)),
            scratch_shapes=scratch_shapes),
        compiler_params=pltpu.CompilerParams(
            dimension_semantics=dims, vmem_limit_bytes=vmem_limit),
        cost_estimate=cost_estimate,
    )


def representation_highlight(hidden_states, key_value_states, params, *,
                             n_heads, eps=1e-6, gate_control=False,
                             mxu_dtype=None, q_block=None, cache_kv=None,
                             approx_recip=True, exp_dtype=None,
                             single_buffer_weights=True, transpose_k=True,
                             vmem_limit_bytes=None):
    B, Sq, D = hidden_states.shape
    _, Skv, _ = key_value_states.shape
    HK = params["wq"].shape[-1]
    d_kv = HK // n_heads

    # MXU operand dtype: bf16 recommended on v5e/v6e/v7x; stats/accumulation stay f32.
    cd = jnp.dtype(mxu_dtype) if mxu_dtype is not None else jnp.dtype(params["wq"].dtype)
    conv = lambda w: w.astype(cd)

    wq = conv(params["wq"])
    wkv = jnp.concatenate([conv(params["wk"]), conv(params["wv"])], axis=-1)  # (D, 2HK)
    wo = conv(params["wo"])
    args = [hidden_states, key_value_states, params["ln_w"], wq, wkv, wo]
    if gate_control:
        w12 = jnp.concatenate([conv(params["w1"]), conv(params["w2"])], axis=0)  # (2D, D)
        args.append(w12)

    if q_block is None:
        q_block = _pick_q_block(Sq, Skv)
    if Sq % q_block != 0:
        q_block = Sq
    n_q = Sq // q_block

    # KV caching across q tiles needs the qi axis to be "arbitrary"; for B == 1 we keep
    # qi "parallel" (recompute K/V) so a v7x second TensorCore is not left idle.
    if cache_kv is None:
        cache_kv = (n_q > 1) and (B >= 2)
    dims = ("parallel", "arbitrary") if cache_kv else ("parallel", "parallel")

    if vmem_limit_bytes is None:
        vmem_limit_bytes = _default_vmem_limit()

    # Advisory cost estimate for XLA's scheduler.
    kv_proj_mults = B * Skv * D * (2 * HK) * (1 if cache_kv else n_q)
    flops = 2 * (B * Sq * D * HK + kv_proj_mults + 2 * B * Sq * Skv * HK + B * Sq * HK * D)
    if gate_control:
        flops += 2 * B * Sq * (2 * D) * D
    transcendentals = B * Sq * Skv * n_heads + B * Sq + (B * Sq * D if gate_control else 0)
    bytes_accessed = (sum(int(a.size) * a.dtype.itemsize for a in args)
                      + B * Sq * D * jnp.dtype(hidden_states.dtype).itemsize)
    cost = pl.CostEstimate(flops=int(flops), transcendentals=int(transcendentals),
                           bytes_accessed=int(bytes_accessed))

    common = dict(B=B, Sq=Sq, Skv=Skv, D=D, HK=HK, n_q=n_q, q_block=q_block,
                  out_dtype=hidden_states.dtype, cd=cd, n_heads=n_heads, d_kv=d_kv,
                  eps=eps, gate_control=gate_control, cache_kv=cache_kv,
                  approx_recip=approx_recip, exp_dtype=exp_dtype,
                  dims=dims, vmem_limit=int(vmem_limit_bytes))

    attempts = [dict(transpose_k=transpose_k, single_buffer=single_buffer_weights,
                     cost_estimate=cost)]
    if transpose_k or single_buffer_weights:
        # Conservative fallback (previously-proven structure) if the optimized
        # configuration fails to lower on this jax/Mosaic version.
        attempts.append(dict(transpose_k=False, single_buffer=False, cost_estimate=None))

    last_err = None
    for opt in attempts:
        try:
            return _build_call(**common, **opt)(*args)
        except Exception as err:   # pragma: no cover - graceful degradation
            last_err = err
    raise last_err


def reference(hidden_states, key_value_states, params, *,
              n_heads, eps=1e-6, gate_control=False):
    """Pure-JAX f32 reference for the same forward pass (fused-head weight layout)."""
    hp = jax.lax.Precision.HIGHEST
    B, Sq, D = hidden_states.shape
    _, Skv, _ = key_value_states.shape
    dk = params["wq"].shape[-1] // n_heads
    f32 = jnp.float32

    h = hidden_states.astype(f32)
    kv = key_value_states.astype(f32)
    var = jnp.mean(h * h, axis=-1, keepdims=True)
    normed = h * jax.lax.rsqrt(var + eps) * params["ln_w"][0].astype(f32)

    q = jnp.einsum("bsd,dk->bsk", normed, params["wq"].astype(f32),
                   precision=hp).reshape(B, Sq, n_heads, dk)
    k = jnp.einsum("bsd,dk->bsk", kv, params["wk"].astype(f32),
                   precision=hp).reshape(B, Skv, n_heads, dk)
    v = jnp.einsum("bsd,dk->bsk", kv, params["wv"].astype(f32),
                   precision=hp).reshape(B, Skv, n_heads, dk)
    scores = jnp.einsum("bqhd,bkhd->bhqk", q, k, precision=hp)   # no 1/sqrt(dk) in T5
    p = jax.nn.softmax(scores, axis=-1)
    ctx = jnp.einsum("bhqk,bkhd->bqhd", p, v, precision=hp).reshape(B, Sq, n_heads * dk)
    attn_out = jnp.einsum("bqk,kd->bqd", ctx, params["wo"].astype(f32), precision=hp)

    if gate_control:
        gate = jax.nn.sigmoid(
            jnp.einsum("bqd,de->bqe", h, params["w1"].astype(f32), precision=hp)
            + jnp.einsum("bqd,de->bqe", attn_out, params["w2"].astype(f32), precision=hp))
        return gate * h + (1.0 - gate) * attn_out
    return h + attn_out


if __name__ == "__main__":
    # Small config: d_model=32, num_heads=4, d_kv=8, batch=2, q_seq=16, kv_seq=16
    B, Sq, Skv, D, H = 2, 16, 16, 32, 4
    DK = D // H
    HK = H * DK
    EPS = 1e-6

    key = jax.random.PRNGKey(0)
    ks = jax.random.split(key, 9)
    hidden_states = jax.random.normal(ks[0], (B, Sq, D), jnp.float32)
    key_value_states = jax.random.normal(ks[1], (B, Skv, D), jnp.float32)
    scale = 1.0 / jnp.sqrt(jnp.float32(D))
    params = {
        "ln_w": 1.0 + 0.1 * jax.random.normal(ks[2], (1, D), jnp.float32),
        "wq": scale * jax.random.normal(ks[3], (D, HK), jnp.float32),
        "wk": scale * jax.random.normal(ks[4], (D, HK), jnp.float32),
        "wv": scale * jax.random.normal(ks[5], (D, HK), jnp.float32),
        "wo": scale * jax.random.normal(ks[6], (HK, D), jnp.float32),
        "w1": scale * jax.random.normal(ks[7], (D, D), jnp.float32),
        "w2": scale * jax.random.normal(ks[8], (D, D), jnp.float32),
    }

    # 1) f32, residual combine, single q tile (no KV-cache path).
    out = representation_highlight(hidden_states, key_value_states, params,
                                   n_heads=H, eps=EPS, gate_control=False)
    out = jax.block_until_ready(out)
    ref = reference(hidden_states, key_value_states, params,
                    n_heads=H, eps=EPS, gate_control=False)
    assert out.shape == (B, Sq, D) and out.dtype == jnp.float32
    assert jnp.allclose(out, ref, atol=1e-2, rtol=1e-2), \
        f"mismatch (residual): max abs err {jnp.max(jnp.abs(out - ref))}"

    # 2) f32, GatedControl combine, two q tiles -> exercises the cached-K/V (pl.when) path.
    out = representation_highlight(hidden_states, key_value_states, params,
                                   n_heads=H, eps=EPS, gate_control=True, q_block=8)
    out = jax.block_until_ready(out)
    ref_gc = reference(hidden_states, key_value_states, params,
                       n_heads=H, eps=EPS, gate_control=True)
    assert jnp.allclose(out, ref_gc, atol=1e-2, rtol=1e-2), \
        f"mismatch (gate_control): max abs err {jnp.max(jnp.abs(out - ref_gc))}"

    # 3) bf16 MXU operands (recommended on v5e/v6e/v7x), cached-K/V path.
    out_bf = representation_highlight(hidden_states, key_value_states, params,
                                      n_heads=H, eps=EPS, gate_control=True, q_block=8,
                                      mxu_dtype=jnp.bfloat16)
    out_bf = jax.block_until_ready(out_bf)
    assert jnp.allclose(out_bf, ref_gc, atol=5e-2, rtol=5e-2), \
        f"bf16 mismatch: max abs err {jnp.max(jnp.abs(out_bf - ref_gc))}"

    print("KERNEL_OK")
</pallas_src>

<mosaic_0001>
module attributes {stable_mosaic.version = 11 : i64} {
  func.func @_rep_highlight_kernel(%arg0: i32, %arg1: i32, %arg2: memref<1x16x32xf32, #tpu.memory_space<vmem>>, %arg3: memref<1x16x32xf32, #tpu.memory_space<vmem>>, %arg4: memref<1x32xf32, #tpu.memory_space<vmem>>, %arg5: memref<32x32xf32, #tpu.memory_space<vmem>>, %arg6: memref<32x64xf32, #tpu.memory_space<vmem>>, %arg7: memref<32x32xf32, #tpu.memory_space<vmem>>, %arg8: memref<1x16x32xf32, #tpu.memory_space<vmem>>, %arg9: memref<32x16xf32, #tpu.memory_space<vmem>>, %arg10: memref<16x32xf32, #tpu.memory_space<vmem>>, %arg11: memref<16x32xf32, #tpu.memory_space<vmem>>) attributes {dimension_semantics = [#tpu.dimension_semantics<parallel>, #tpu.dimension_semantics<parallel>], iteration_bounds = array<i64: 2, 1>, scalar_prefetch = 0 : i64, scratch_operands = 3 : i64, tpu.core_type = #tpu.core_type<tc>, window_params = [{transform_indices = @transform_0, window_bounds = array<i64: 1, 16, 32>}, {transform_indices = @transform_1, window_bounds = array<i64: 1, 16, 32>}, {pipeline_mode = #tpu.pipeline_mode<synchronous>, transform_indices = @transform_2, window_bounds = array<i64: 1, 32>}, {pipeline_mode = #tpu.pipeline_mode<synchronous>, transform_indices = @transform_3, window_bounds = array<i64: 32, 32>}, {pipeline_mode = #tpu.pipeline_mode<synchronous>, transform_indices = @transform_4, window_bounds = array<i64: 32, 64>}, {pipeline_mode = #tpu.pipeline_mode<synchronous>, transform_indices = @transform_5, window_bounds = array<i64: 32, 32>}, {transform_indices = @transform_6, window_bounds = array<i64: 1, 16, 32>}]} {
    %c0 = arith.constant 0 : index
    %c0_0 = arith.constant 0 : index
    %c0_1 = arith.constant 0 : index
    %0 = vector.load %arg3[%c0, %c0_0, %c0_1] : memref<1x16x32xf32, #tpu.memory_space<vmem>>, vector<1x16x32xf32>
    %1 = vector.shape_cast %0 : vector<1x16x32xf32> to vector<16x32xf32>
    %c0_2 = arith.constant 0 : index
    %c0_3 = arith.constant 0 : index
    %2 = vector.load %arg6[%c0_2, %c0_3] : memref<32x64xf32, #tpu.memory_space<vmem>>, vector<32x64xf32>
    %cst = arith.constant dense<0.000000e+00> : vector<16x64xf32>
    %3 = tpu.matmul %1, %2, %cst {dimension_numbers = #tpu.dot_dimension_numbers<[1], [0], [0], [1], [0, 0, 1, 1], [], []>} : vector<16x32xf32>, vector<32x64xf32>, vector<16x64xf32> -> vector<16x64xf32>
    %4 = vector.extract_strided_slice %3 {offsets = [0, 0], sizes = [16, 32], strides = [1, 1]} : vector<16x64xf32> to vector<16x32xf32>
    %5 = tpu.transpose %4, [1, 0] : vector<16x32xf32> -> vector<32x16xf32>
    %c0_4 = arith.constant 0 : index
    %c0_5 = arith.constant 0 : index
    %6 = vector.load %arg9[%c0_4, %c0_5] : memref<32x16xf32, #tpu.memory_space<vmem>>, vector<32x16xf32>
    tpu.vector_store %arg9[%c0_4, %c0_5], %5 {strides = array<i32>} : memref<32x16xf32, #tpu.memory_space<vmem>>, vector<32x16xf32>,
    %7 = vector.extract_strided_slice %3 {offsets = [0, 32], sizes = [16, 32], strides = [1, 1]} : vector<16x64xf32> to vector<16x32xf32>
    %c0_6 = arith.constant 0 : index
    %c0_7 = arith.constant 0 : index
    %8 = vector.load %arg10[%c0_6, %c0_7] : memref<16x32xf32, #tpu.memory_space<vmem>>, vector<16x32xf32>
    tpu.vector_store %arg10[%c0_6, %c0_7], %7 {strides = array<i32>} : memref<16x32xf32, #tpu.memory_space<vmem>>, vector<16x32xf32>,
    %c0_8 = arith.constant 0 : index
    %c0_9 = arith.constant 0 : index
    %c0_10 = arith.constant 0 : index
    %9 = vector.load %arg2[%c0_8, %c0_9, %c0_10] : memref<1x16x32xf32, #tpu.memory_space<vmem>>, vector<1x16x32xf32>
    %10 = vector.shape_cast %9 : vector<1x16x32xf32> to vector<16x32xf32>
    %11 = arith.mulf %10, %10 : vector<16x32xf32>
    %cst_11 = arith.constant dense<0.000000e+00> : vector<16xf32>
    %12 = vector.multi_reduction <add>, %11, %cst_11 [1] : vector<16x32xf32> to vector<16xf32>
    %13 = vector.shape_cast %12 : vector<16xf32> to vector<16x1xf32>
    %cst_12 = arith.constant 3.200000e+01 : f32
    %14 = vector.broadcast %cst_12 : f32 to vector<16x1xf32>
    %15 = arith.divf %13, %14 : vector<16x1xf32>
    %cst_13 = arith.constant 9.99999997E-7 : f32
    %16 = vector.broadcast %cst_13 : f32 to vector<16x1xf32>
    %17 = arith.addf %15, %16 : vector<16x1xf32>
    %18 = math.rsqrt %17 : vector<16x1xf32>
    %19 = vector.broadcast %18 : vector<16x1xf32> to vector<16x32xf32>
    %20 = arith.mulf %10, %19 : vector<16x32xf32>
    %c0_14 = arith.constant 0 : index
    %c0_15 = arith.constant 0 : index
    %21 = vector.load %arg4[%c0_14, %c0_15] : memref<1x32xf32, #tpu.memory_space<vmem>>, vector<1x32xf32>
    %22 = vector.broadcast %21 : vector<1x32xf32> to vector<16x32xf32>
    %23 = arith.mulf %20, %22 : vector<16x32xf32>
    %c0_16 = arith.constant 0 : index
    %c0_17 = arith.constant 0 : index
    %24 = vector.load %arg5[%c0_16, %c0_17] : memref<32x32xf32, #tpu.memory_space<vmem>>, vector<32x32xf32>
    %cst_18 = arith.constant dense<0.000000e+00> : vector<16x32xf32>
    %25 = tpu.matmul %23, %24, %cst_18 {dimension_numbers = #tpu.dot_dimension_numbers<[1], [0], [0], [1], [0, 0, 1, 1], [], []>} : vector<16x32xf32>, vector<32x32xf32>, vector<16x32xf32> -> vector<16x32xf32>
    %26 = vector.extract_strided_slice %25 {offsets = [0, 0], sizes = [16, 8], strides = [1, 1]} : vector<16x32xf32> to vector<16x8xf32>
    %c0_19 = arith.constant 0 : index
    %c0_20 = arith.constant 0 : index
    %27 = vector.load %arg9[%c0_19, %c0_20] : memref<32x16xf32, #tpu.memory_space<vmem>>, vector<8x16xf32>
    %cst_21 = arith.constant dense<0.000000e+00> : vector<16x16xf32>
    %28 = tpu.matmul %26, %27, %cst_21 {dimension_numbers = #tpu.dot_dimension_numbers<[1], [0], [0], [1], [0, 0, 1, 1], [], []>} : vector<16x8xf32>, vector<8x16xf32>, vector<16x16xf32> -> vector<16x16xf32>
    %cst_22 = arith.constant dense<0xFF800000> : vector<16xf32>
    %29 = vector.multi_reduction <maximumf>, %28, %cst_22 [1] : vector<16x16xf32> to vector<16xf32>
    %30 = vector.shape_cast %29 : vector<16xf32> to vector<16x1xf32>
    %31 = vector.broadcast %30 : vector<16x1xf32> to vector<16x16xf32>
    %32 = arith.subf %28, %31 : vector<16x16xf32>
    %33 = math.exp %32 : vector<16x16xf32>
    %cst_23 = arith.constant dense<0.000000e+00> : vector<16xf32>
    %34 = vector.multi_reduction <add>, %33, %cst_23 [1] : vector<16x16xf32> to vector<16xf32>
    %35 = vector.shape_cast %34 : vector<16xf32> to vector<16x1xf32>
    %c0_24 = arith.constant 0 : index
    %c0_25 = arith.constant 0 : index
    %36 = vector.load %arg10[%c0_24, %c0_25] : memref<16x32xf32, #tpu.memory_space<vmem>>, vector<16x8xf32>
    %cst_26 = arith.constant dense<0.000000e+00> : vector<16x8xf32>
    %37 = tpu.matmul %33, %36, %cst_26 {dimension_numbers = #tpu.dot_dimension_numbers<[1], [0], [0], [1], [0, 0, 1, 1], [], []>} : vector<16x16xf32>, vector<16x8xf32>, vector<16x8xf32> -> vector<16x8xf32>
    %38 = tpu.reciprocal %35 {approx = true} : vector<16x1xf32> -> vector<16x1xf32>
    %39 = vector.broadcast %38 : vector<16x1xf32> to vector<16x8xf32>
    %40 = arith.mulf %37, %39 : vector<16x8xf32>
    %c0_27 = arith.constant 0 : index
    %c0_28 = arith.constant 0 : index
    %41 = vector.load %arg11[%c0_27, %c0_28] : memref<16x32xf32, #tpu.memory_space<vmem>>, vector<16x8xf32>
    tpu.vector_store %arg11[%c0_27, %c0_28], %40 {strides = array<i32>} : memref<16x32xf32, #tpu.memory_space<vmem>>, vector<16x8xf32>,
    %42 = vector.extract_strided_slice %25 {offsets = [0, 8], sizes = [16, 8], strides = [1, 1]} : vector<16x32xf32> to vector<16x8xf32>
    %c8 = arith.constant 8 : index
    %c0_29 = arith.constant 0 : index
    %43 = vector.load %arg9[%c8, %c0_29] : memref<32x16xf32, #tpu.memory_space<vmem>>, vector<8x16xf32>
    %cst_30 = arith.constant dense<0.000000e+00> : vector<16x16xf32>
    %44 = tpu.matmul %42, %43, %cst_30 {dimension_numbers = #tpu.dot_dimension_numbers<[1], [0], [0], [1], [0, 0, 1, 1], [], []>} : vector<16x8xf32>, vector<8x16xf32>, vector<16x16xf32> -> vector<16x16xf32>
    %cst_31 = arith.constant dense<0xFF800000> : vector<16xf32>
    %45 = vector.multi_reduction <maximumf>, %44, %cst_31 [1] : vector<16x16xf32> to vector<16xf32>
    %46 = vector.shape_cast %45 : vector<16xf32> to vector<16x1xf32>
    %47 = vector.broadcast %46 : vector<16x1xf32> to vector<16x16xf32>
    %48 = arith.subf %44, %47 : vector<16x16xf32>
    %49 = math.exp %48 : vector<16x16xf32>
    %cst_32 = arith.constant dense<0.000000e+00> : vector<16xf32>
    %50 = vector.multi_reduction <add>, %49, %cst_32 [1] : vector<16x16xf32> to vector<16xf32>
    %51 = vector.shape_cast %50 : vector<16xf32> to vector<16x1xf32>
    %c0_33 = arith.constant 0 : index
    %c8_34 = arith.constant 8 : index
    %52 = vector.load %arg10[%c0_33, %c8_34] : memref<16x32xf32, #tpu.memory_space<vmem>>, vector<16x8xf32>
    %cst_35 = arith.constant dense<0.000000e+00> : vector<16x8xf32>
    %53 = tpu.matmul %49, %52, %cst_35 {dimension_numbers = #tpu.dot_dimension_numbers<[1], [0], [0], [1], [0, 0, 1, 1], [], []>} : vector<16x16xf32>, vector<16x8xf32>, vector<16x8xf32> -> vector<16x8xf32>
    %54 = tpu.reciprocal %51 {approx = true} : vector<16x1xf32> -> vector<16x1xf32>
    %55 = vector.broadcast %54 : vector<16x1xf32> to vector<16x8xf32>
    %56 = arith.mulf %53, %55 : vector<16x8xf32>
    %c0_36 = arith.constant 0 : index
    %c8_37 = arith.constant 8 : index
    %57 = vector.load %arg11[%c0_36, %c8_37] : memref<16x32xf32, #tpu.memory_space<vmem>>, vector<16x8xf32>
    tpu.vector_store %arg11[%c0_36, %c8_37], %56 {strides = array<i32>} : memref<16x32xf32, #tpu.memory_space<vmem>>, vector<16x8xf32>,
    %58 = vector.extract_strided_slice %25 {offsets = [0, 16], sizes = [16, 8], strides = [1, 1]} : vector<16x32xf32> to vector<16x8xf32>
    %c16 = arith.constant 16 : index
    %c0_38 = arith.constant 0 : index
    %59 = vector.load %arg9[%c16, %c0_38] : memref<32x16xf32, #tpu.memory_space<vmem>>, vector<8x16xf32>
    %cst_39 = arith.constant dense<0.000000e+00> : vector<16x16xf32>
    %60 = tpu.matmul %58, %59, %cst_39 {dimension_numbers = #tpu.dot_dimension_numbers<[1], [0], [0], [1], [0, 0, 1, 1], [], []>} : vector<16x8xf32>, vector<8x16xf32>, vector<16x16xf32> -> vector<16x16xf32>
    %cst_40 = arith.constant dense<0xFF800000> : vector<16xf32>
    %61 = vector.multi_reduction <maximumf>, %60, %cst_40 [1] : vector<16x16xf32> to vector<16xf32>
    %62 = vector.shape_cast %61 : vector<16xf32> to vector<16x1xf32>
    %63 = vector.broadcast %62 : vector<16x1xf32> to vector<16x16xf32>
    %64 = arith.subf %60, %63 : vector<16x16xf32>
    %65 = math.exp %64 : vector<16x16xf32>
    %cst_41 = arith.constant dense<0.000000e+00> : vector<16xf32>
    %66 = vector.multi_reduction <add>, %65, %cst_41 [1] : vector<16x16xf32> to vector<16xf32>
    %67 = vector.shape_cast %66 : vector<16xf32> to vector<16x1xf32>
    %c0_42 = arith.constant 0 : index
    %c16_43 = arith.constant 16 : index
    %68 = vector.load %arg10[%c0_42, %c16_43] : memref<16x32xf32, #tpu.memory_space<vmem>>, vector<16x8xf32>
    %cst_44 = arith.constant dense<0.000000e+00> : vector<16x8xf32>
    %69 = tpu.matmul %65, %68, %cst_44 {dimension_numbers = #tpu.dot_dimension_numbers<[1], [0], [0], [1], [0, 0, 1, 1], [], []>} : vector<16x16xf32>, vector<16x8xf32>, vector<16x8xf32> -> vector<16x8xf32>
    %70 = tpu.reciprocal %67 {approx = true} : vector<16x1xf32> -> vector<16x1xf32>
    %71 = vector.broadcast %70 : vector<16x1xf32> to vector<16x8xf32>
    %72 = arith.mulf %69, %71 : vector<16x8xf32>
    %c0_45 = arith.constant 0 : index
    %c16_46 = arith.constant 16 : index
    %73 = vector.load %arg11[%c0_45, %c16_46] : memref<16x32xf32, #tpu.memory_space<vmem>>, vector<16x8xf32>
    tpu.vector_store %arg11[%c0_45, %c16_46], %72 {strides = array<i32>} : memref<16x32xf32, #tpu.memory_space<vmem>>, vector<16x8xf32>,
    %74 = vector.extract_strided_slice %25 {offsets = [0, 24], sizes = [16, 8], strides = [1, 1]} : vector<16x32xf32> to vector<16x8xf32>
    %c24 = arith.constant 24 : index
    %c0_47 = arith.constant 0 : index
    %75 = vector.load %arg9[%c24, %c0_47] : memref<32x16xf32, #tpu.memory_space<vmem>>, vector<8x16xf32>
    %cst_48 = arith.constant dense<0.000000e+00> : vector<16x16xf32>
    %76 = tpu.matmul %74, %75, %cst_48 {dimension_numbers = #tpu.dot_dimension_numbers<[1], [0], [0], [1], [0, 0, 1, 1], [], []>} : vector<16x8xf32>, vector<8x16xf32>, vector<16x16xf32> -> vector<16x16xf32>
    %cst_49 = arith.constant dense<0xFF800000> : vector<16xf32>
    %77 = vector.multi_reduction <maximumf>, %76, %cst_49 [1] : vector<16x16xf32> to vector<16xf32>
    %78 = vector.shape_cast %77 : vector<16xf32> to vector<16x1xf32>
    %79 = vector.broadcast %78 : vector<16x1xf32> to vector<16x16xf32>
    %80 = arith.subf %76, %79 : vector<16x16xf32>
    %81 = math.exp %80 : vector<16x16xf32>
    %cst_50 = arith.constant dense<0.000000e+00> : vector<16xf32>
    %82 = vector.multi_reduction <add>, %81, %cst_50 [1] : vector<16x16xf32> to vector<16xf32>
    %83 = vector.shape_cast %82 : vector<16xf32> to vector<16x1xf32>
    %c0_51 = arith.constant 0 : index
    %c24_52 = arith.constant 24 : index
    %84 = vector.load %arg10[%c0_51, %c24_52] : memref<16x32xf32, #tpu.memory_space<vmem>>, vector<16x8xf32>
    %cst_53 = arith.constant dense<0.000000e+00> : vector<16x8xf32>
    %85 = tpu.matmul %81, %84, %cst_53 {dimension_numbers = #tpu.dot_dimension_numbers<[1], [0], [0], [1], [0, 0, 1, 1], [], []>} : vector<16x16xf32>, vector<16x8xf32>, vector<16x8xf32> -> vector<16x8xf32>
    %86 = tpu.reciprocal %83 {approx = true} : vector<16x1xf32> -> vector<16x1xf32>
    %87 = vector.broadcast %86 : vector<16x1xf32> to vector<16x8xf32>
    %88 = arith.mulf %85, %87 : vector<16x8xf32>
    %c0_54 = arith.constant 0 : index
    %c24_55 = arith.constant 24 : index
    %89 = vector.load %arg11[%c0_54, %c24_55] : memref<16x32xf32, #tpu.memory_space<vmem>>, vector<16x8xf32>
    tpu.vector_store %arg11[%c0_54, %c24_55], %88 {strides = array<i32>} : memref<16x32xf32, #tpu.memory_space<vmem>>, vector<16x8xf32>,
    %c0_56 = arith.constant 0 : index
    %c0_57 = arith.constant 0 : index
    %90 = vector.load %arg11[%c0_56, %c0_57] : memref<16x32xf32, #tpu.memory_space<vmem>>, vector<16x32xf32>
    %c0_58 = arith.constant 0 : index
    %c0_59 = arith.constant 0 : index
    %91 = vector.load %arg7[%c0_58, %c0_59] : memref<32x32xf32, #tpu.memory_space<vmem>>, vector<32x32xf32>
    %cst_60 = arith.constant dense<0.000000e+00> : vector<16x32xf32>
    %92 = tpu.matmul %90, %91, %cst_60 {dimension_numbers = #tpu.dot_dimension_numbers<[1], [0], [0], [1], [0, 0, 1, 1], [], []>} : vector<16x32xf32>, vector<32x32xf32>, vector<16x32xf32> -> vector<16x32xf32>
    %93 = arith.addf %10, %92 : vector<16x32xf32>
    %c0_61 = arith.constant 0 : index
    %c0_62 = arith.constant 0 : index
    %c0_63 = arith.constant 0 : index
    %94 = vector.load %arg8[%c0_61, %c0_62, %c0_63] : memref<1x16x32xf32, #tpu.memory_space<vmem>>, vector<1x16x32xf32>
    %95 = vector.shape_cast %94 : vector<1x16x32xf32> to vector<16x32xf32>
    %96 = vector.shape_cast %93 : vector<16x32xf32> to vector<1x16x32xf32>
    tpu.vector_store %arg8[%c0_61, %c0_62, %c0_63], %96 {strides = array<i32>} : memref<1x16x32xf32, #tpu.memory_space<vmem>>, vector<1x16x32xf32>,
    return
  }
  func.func @transform_0(%arg0: i32, %arg1: i32) -> (i32, i32, i32) {
    %c0_i32 = arith.constant 0 : i32
    %c0_i32_0 = arith.constant 0 : i32
    return %arg0, %arg1, %c0_i32 : i32, i32, i32
  }
  func.func @transform_1(%arg0: i32, %arg1: i32) -> (i32, i32, i32) {
    %c0_i32 = arith.constant 0 : i32
    %c0_i32_0 = arith.constant 0 : i32
    %c0_i32_1 = arith.constant 0 : i32
    return %arg0, %c0_i32, %c0_i32_0 : i32, i32, i32
  }
  func.func @transform_2(%arg0: i32, %arg1: i32) -> (i32, i32) {
    %c0_i32 = arith.constant 0 : i32
    %c0_i32_0 = arith.constant 0 : i32
    %c0_i32_1 = arith.constant 0 : i32
    return %c0_i32, %c0_i32_0 : i32, i32
  }
  func.func @transform_3(%arg0: i32, %arg1: i32) -> (i32, i32) {
    %c0_i32 = arith.constant 0 : i32
    %c0_i32_0 = arith.constant 0 : i32
    %c0_i32_1 = arith.constant 0 : i32
    return %c0_i32, %c0_i32_0 : i32, i32
  }
  func.func @transform_4(%arg0: i32, %arg1: i32) -> (i32, i32) {
    %c0_i32 = arith.constant 0 : i32
    %c0_i32_0 = arith.constant 0 : i32
    %c0_i32_1 = arith.constant 0 : i32
    return %c0_i32, %c0_i32_0 : i32, i32
  }
  func.func @transform_5(%arg0: i32, %arg1: i32) -> (i32, i32) {
    %c0_i32 = arith.constant 0 : i32
    %c0_i32_0 = arith.constant 0 : i32
    %c0_i32_1 = arith.constant 0 : i32
    return %c0_i32, %c0_i32_0 : i32, i32
  }
  func.func @transform_6(%arg0: i32, %arg1: i32) -> (i32, i32, i32) {
    %c0_i32 = arith.constant 0 : i32
    %c0_i32_0 = arith.constant 0 : i32
    return %arg0, %arg1, %c0_i32 : i32, i32, i32
  }
}

module attributes {stable_mosaic.version = 11 : i64} {
  func.func @_rep_highlight_kernel(%arg0: i32, %arg1: i32, %arg2: memref<1x16x32xf32, #tpu.memory_space<vmem>>, %arg3: memref<1x16x32xf32, #tpu.memory_space<vmem>>, %arg4: memref<1x32xf32, #tpu.memory_space<vmem>>, %arg5: memref<32x32xf32, #tpu.memory_space<vmem>>, %arg6: memref<32x64xf32, #tpu.memory_space<vmem>>, %arg7: memref<32x32xf32, #tpu.memory_space<vmem>>, %arg8: memref<1x16x32xf32, #tpu.memory_space<vmem>>, %arg9: memref<16x32xf32, #tpu.memory_space<vmem>>, %arg10: memref<16x32xf32, #tpu.memory_space<vmem>>, %arg11: memref<16x32xf32, #tpu.memory_space<vmem>>) attributes {dimension_semantics = [#tpu.dimension_semantics<parallel>, #tpu.dimension_semantics<parallel>], iteration_bounds = array<i64: 2, 1>, scalar_prefetch = 0 : i64, scratch_operands = 3 : i64, tpu.core_type = #tpu.core_type<tc>, window_params = [{transform_indices = @transform_0, window_bounds = array<i64: 1, 16, 32>}, {transform_indices = @transform_1, window_bounds = array<i64: 1, 16, 32>}, {pipeline_mode = #tpu.pipeline_mode<synchronous>, transform_indices = @transform_2, window_bounds = array<i64: 1, 32>}, {pipeline_mode = #tpu.pipeline_mode<synchronous>, transform_indices = @transform_3, window_bounds = array<i64: 32, 32>}, {pipeline_mode = #tpu.pipeline_mode<synchronous>, transform_indices = @transform_4, window_bounds = array<i64: 32, 64>}, {pipeline_mode = #tpu.pipeline_mode<synchronous>, transform_indices = @transform_5, window_bounds = array<i64: 32, 32>}, {transform_indices = @transform_6, window_bounds = array<i64: 1, 16, 32>}]} {
    %c0 = arith.constant 0 : index
    %c0_0 = arith.constant 0 : index
    %c0_1 = arith.constant 0 : index
    %0 = vector.load %arg3[%c0, %c0_0, %c0_1] : memref<1x16x32xf32, #tpu.memory_space<vmem>>, vector<1x16x32xf32>
    %1 = vector.shape_cast %0 : vector<1x16x32xf32> to vector<16x32xf32>
    %c0_2 = arith.constant 0 : index
    %c0_3 = arith.constant 0 : index
    %2 = vector.load %arg6[%c0_2, %c0_3] : memref<32x64xf32, #tpu.memory_space<vmem>>, vector<32x64xf32>
    %cst = arith.constant dense<0.000000e+00> : vector<16x64xf32>
    %3 = tpu.matmul %1, %2, %cst {dimension_numbers = #tpu.dot_dimension_numbers<[1], [0], [0], [1], [0, 0, 1, 1], [], []>} : vector<16x32xf32>, vector<32x64xf32>, vector<16x64xf32> -> vector<16x64xf32>
    %4 = vector.extract_strided_slice %3 {offsets = [0, 0], sizes = [16, 32], strides = [1, 1]} : vector<16x64xf32> to vector<16x32xf32>
    %c0_4 = arith.constant 0 : index
    %c0_5 = arith.constant 0 : index
    %5 = vector.load %arg9[%c0_4, %c0_5] : memref<16x32xf32, #tpu.memory_space<vmem>>, vector<16x32xf32>
    tpu.vector_store %arg9[%c0_4, %c0_5], %4 {strides = array<i32>} : memref<16x32xf32, #tpu.memory_space<vmem>>, vector<16x32xf32>,
    %6 = vector.extract_strided_slice %3 {offsets = [0, 32], sizes = [16, 32], strides = [1, 1]} : vector<16x64xf32> to vector<16x32xf32>
    %c0_6 = arith.constant 0 : index
    %c0_7 = arith.constant 0 : index
    %7 = vector.load %arg10[%c0_6, %c0_7] : memref<16x32xf32, #tpu.memory_space<vmem>>, vector<16x32xf32>
    tpu.vector_store %arg10[%c0_6, %c0_7], %6 {strides = array<i32>} : memref<16x32xf32, #tpu.memory_space<vmem>>, vector<16x32xf32>,
    %c0_8 = arith.constant 0 : index
    %c0_9 = arith.constant 0 : index
    %c0_10 = arith.constant 0 : index
    %8 = vector.load %arg2[%c0_8, %c0_9, %c0_10] : memref<1x16x32xf32, #tpu.memory_space<vmem>>, vector<1x16x32xf32>
    %9 = vector.shape_cast %8 : vector<1x16x32xf32> to vector<16x32xf32>
    %10 = arith.mulf %9, %9 : vector<16x32xf32>
    %cst_11 = arith.constant dense<0.000000e+00> : vector<16xf32>
    %11 = vector.multi_reduction <add>, %10, %cst_11 [1] : vector<16x32xf32> to vector<16xf32>
    %12 = vector.shape_cast %11 : vector<16xf32> to vector<16x1xf32>
    %cst_12 = arith.constant 3.200000e+01 : f32
    %13 = vector.broadcast %cst_12 : f32 to vector<16x1xf32>
    %14 = arith.divf %12, %13 : vector<16x1xf32>
    %cst_13 = arith.constant 9.99999997E-7 : f32
    %15 = vector.broadcast %cst_13 : f32 to vector<16x1xf32>
    %16 = arith.addf %14, %15 : vector<16x1xf32>
    %17 = math.rsqrt %16 : vector<16x1xf32>
    %18 = vector.broadcast %17 : vector<16x1xf32> to vector<16x32xf32>
    %19 = arith.mulf %9, %18 : vector<16x32xf32>
    %c0_14 = arith.constant 0 : index
    %c0_15 = arith.constant 0 : index
    %20 = vector.load %arg4[%c0_14, %c0_15] : memref<1x32xf32, #tpu.memory_space<vmem>>, vector<1x32xf32>
    %21 = vector.broadcast %20 : vector<1x32xf32> to vector<16x32xf32>
    %22 = arith.mulf %19, %21 : vector<16x32xf32>
    %c0_16 = arith.constant 0 : index
    %c0_17 = arith.constant 0 : index
    %23 = vector.load %arg5[%c0_16, %c0_17] : memref<32x32xf32, #tpu.memory_space<vmem>>, vector<32x32xf32>
    %cst_18 = arith.constant dense<0.000000e+00> : vector<16x32xf32>
    %24 = tpu.matmul %22, %23, %cst_18 {dimension_numbers = #tpu.dot_dimension_numbers<[1], [0], [0], [1], [0, 0, 1, 1], [], []>} : vector<16x32xf32>, vector<32x32xf32>, vector<16x32xf32> -> vector<16x32xf32>
    %25 = vector.extract_strided_slice %24 {offsets = [0, 0], sizes = [16, 8], strides = [1, 1]} : vector<16x32xf32> to vector<16x8xf32>
    %c0_19 = arith.constant 0 : index
    %c0_20 = arith.constant 0 : index
    %26 = vector.load %arg9[%c0_19, %c0_20] : memref<16x32xf32, #tpu.memory_space<vmem>>, vector<16x8xf32>
    %cst_21 = arith.constant dense<0.000000e+00> : vector<16x16xf32>
    %27 = tpu.matmul %25, %26, %cst_21 {dimension_numbers = #tpu.dot_dimension_numbers<[1], [1], [0], [0], [0, 0, 1, 0], [], []>} : vector<16x8xf32>, vector<16x8xf32>, vector<16x16xf32> -> vector<16x16xf32>
    %cst_22 = arith.constant dense<0xFF800000> : vector<16xf32>
    %28 = vector.multi_reduction <maximumf>, %27, %cst_22 [1] : vector<16x16xf32> to vector<16xf32>
    %29 = vector.shape_cast %28 : vector<16xf32> to vector<16x1xf32>
    %30 = vector.broadcast %29 : vector<16x1xf32> to vector<16x16xf32>
    %31 = arith.subf %27, %30 : vector<16x16xf32>
    %32 = math.exp %31 : vector<16x16xf32>
    %cst_23 = arith.constant dense<0.000000e+00> : vector<16xf32>
    %33 = vector.multi_reduction <add>, %32, %cst_23 [1] : vector<16x16xf32> to vector<16xf32>
    %34 = vector.shape_cast %33 : vector<16xf32> to vector<16x1xf32>
    %c0_24 = arith.constant 0 : index
    %c0_25 = arith.constant 0 : index
    %35 = vector.load %arg10[%c0_24, %c0_25] : memref<16x32xf32, #tpu.memory_space<vmem>>, vector<16x8xf32>
    %cst_26 = arith.constant dense<0.000000e+00> : vector<16x8xf32>
    %36 = tpu.matmul %32, %35, %cst_26 {dimension_numbers = #tpu.dot_dimension_numbers<[1], [0], [0], [1], [0, 0, 1, 1], [], []>} : vector<16x16xf32>, vector<16x8xf32>, vector<16x8xf32> -> vector<16x8xf32>
    %37 = tpu.reciprocal %34 {approx = true} : vector<16x1xf32> -> vector<16x1xf32>
    %38 = vector.broadcast %37 : vector<16x1xf32> to vector<16x8xf32>
    %39 = arith.mulf %36, %38 : vector<16x8xf32>
    %c0_27 = arith.constant 0 : index
    %c0_28 = arith.constant 0 : index
    %40 = vector.load %arg11[%c0_27, %c0_28] : memref<16x32xf32, #tpu.memory_space<vmem>>, vector<16x8xf32>
    tpu.vector_store %arg11[%c0_27, %c0_28], %39 {strides = array<i32>} : memref<16x32xf32, #tpu.memory_space<vmem>>, vector<16x8xf32>,
    %41 = vector.extract_strided_slice %24 {offsets = [0, 8], sizes = [16, 8], strides = [1, 1]} : vector<16x32xf32> to vector<16x8xf32>
    %c0_29 = arith.constant 0 : index
    %c8 = arith.constant 8 : index
    %42 = vector.load %arg9[%c0_29, %c8] : memref<16x32xf32, #tpu.memory_space<vmem>>, vector<16x8xf32>
    %cst_30 = arith.constant dense<0.000000e+00> : vector<16x16xf32>
    %43 = tpu.matmul %41, %42, %cst_30 {dimension_numbers = #tpu.dot_dimension_numbers<[1], [1], [0], [0], [0, 0, 1, 0], [], []>} : vector<16x8xf32>, vector<16x8xf32>, vector<16x16xf32> -> vector<16x16xf32>
    %cst_31 = arith.constant dense<0xFF800000> : vector<16xf32>
    %44 = vector.multi_reduction <maximumf>, %43, %cst_31 [1] : vector<16x16xf32> to vector<16xf32>
    %45 = vector.shape_cast %44 : vector<16xf32> to vector<16x1xf32>
    %46 = vector.broadcast %45 : vector<16x1xf32> to vector<16x16xf32>
    %47 = arith.subf %43, %46 : vector<16x16xf32>
    %48 = math.exp %47 : vector<16x16xf32>
    %cst_32 = arith.constant dense<0.000000e+00> : vector<16xf32>
    %49 = vector.multi_reduction <add>, %48, %cst_32 [1] : vector<16x16xf32> to vector<16xf32>
    %50 = vector.shape_cast %49 : vector<16xf32> to vector<16x1xf32>
    %c0_33 = arith.constant 0 : index
    %c8_34 = arith.constant 8 : index
    %51 = vector.load %arg10[%c0_33, %c8_34] : memref<16x32xf32, #tpu.memory_space<vmem>>, vector<16x8xf32>
    %cst_35 = arith.constant dense<0.000000e+00> : vector<16x8xf32>
    %52 = tpu.matmul %48, %51, %cst_35 {dimension_numbers = #tpu.dot_dimension_numbers<[1], [0], [0], [1], [0, 0, 1, 1], [], []>} : vector<16x16xf32>, vector<16x8xf32>, vector<16x8xf32> -> vector<16x8xf32>
    %53 = tpu.reciprocal %50 {approx = true} : vector<16x1xf32> -> vector<16x1xf32>
    %54 = vector.broadcast %53 : vector<16x1xf32> to vector<16x8xf32>
    %55 = arith.mulf %52, %54 : vector<16x8xf32>
    %c0_36 = arith.constant 0 : index
    %c8_37 = arith.constant 8 : index
    %56 = vector.load %arg11[%c0_36, %c8_37] : memref<16x32xf32, #tpu.memory_space<vmem>>, vector<16x8xf32>
    tpu.vector_store %arg11[%c0_36, %c8_37], %55 {strides = array<i32>} : memref<16x32xf32, #tpu.memory_space<vmem>>, vector<16x8xf32>,
    %57 = vector.extract_strided_slice %24 {offsets = [0, 16], sizes = [16, 8], strides = [1, 1]} : vector<16x32xf32> to vector<16x8xf32>
    %c0_38 = arith.constant 0 : index
    %c16 = arith.constant 16 : index
    %58 = vector.load %arg9[%c0_38, %c16] : memref<16x32xf32, #tpu.memory_space<vmem>>, vector<16x8xf32>
    %cst_39 = arith.constant dense<0.000000e+00> : vector<16x16xf32>
    %59 = tpu.matmul %57, %58, %cst_39 {dimension_numbers = #tpu.dot_dimension_numbers<[1], [1], [0], [0], [0, 0, 1, 0], [], []>} : vector<16x8xf32>, vector<16x8xf32>, vector<16x16xf32> -> vector<16x16xf32>
    %cst_40 = arith.constant dense<0xFF800000> : vector<16xf32>
    %60 = vector.multi_reduction <maximumf>, %59, %cst_40 [1] : vector<16x16xf32> to vector<16xf32>
    %61 = vector.shape_cast %60 : vector<16xf32> to vector<16x1xf32>
    %62 = vector.broadcast %61 : vector<16x1xf32> to vector<16x16xf32>
    %63 = arith.subf %59, %62 : vector<16x16xf32>
    %64 = math.exp %63 : vector<16x16xf32>
    %cst_41 = arith.constant dense<0.000000e+00> : vector<16xf32>
    %65 = vector.multi_reduction <add>, %64, %cst_41 [1] : vector<16x16xf32> to vector<16xf32>
    %66 = vector.shape_cast %65 : vector<16xf32> to vector<16x1xf32>
    %c0_42 = arith.constant 0 : index
    %c16_43 = arith.constant 16 : index
    %67 = vector.load %arg10[%c0_42, %c16_43] : memref<16x32xf32, #tpu.memory_space<vmem>>, vector<16x8xf32>
    %cst_44 = arith.constant dense<0.000000e+00> : vector<16x8xf32>
    %68 = tpu.matmul %64, %67, %cst_44 {dimension_numbers = #tpu.dot_dimension_numbers<[1], [0], [0], [1], [0, 0, 1, 1], [], []>} : vector<16x16xf32>, vector<16x8xf32>, vector<16x8xf32> -> vector<16x8xf32>
    %69 = tpu.reciprocal %66 {approx = true} : vector<16x1xf32> -> vector<16x1xf32>
    %70 = vector.broadcast %69 : vector<16x1xf32> to vector<16x8xf32>
    %71 = arith.mulf %68, %70 : vector<16x8xf32>
    %c0_45 = arith.constant 0 : index
    %c16_46 = arith.constant 16 : index
    %72 = vector.load %arg11[%c0_45, %c16_46] : memref<16x32xf32, #tpu.memory_space<vmem>>, vector<16x8xf32>
    tpu.vector_store %arg11[%c0_45, %c16_46], %71 {strides = array<i32>} : memref<16x32xf32, #tpu.memory_space<vmem>>, vector<16x8xf32>,
    %73 = vector.extract_strided_slice %24 {offsets = [0, 24], sizes = [16, 8], strides = [1, 1]} : vector<16x32xf32> to vector<16x8xf32>
    %c0_47 = arith.constant 0 : index
    %c24 = arith.constant 24 : index
    %74 = vector.load %arg9[%c0_47, %c24] : memref<16x32xf32, #tpu.memory_space<vmem>>, vector<16x8xf32>
    %cst_48 = arith.constant dense<0.000000e+00> : vector<16x16xf32>
    %75 = tpu.matmul %73, %74, %cst_48 {dimension_numbers = #tpu.dot_dimension_numbers<[1], [1], [0], [0], [0, 0, 1, 0], [], []>} : vector<16x8xf32>, vector<16x8xf32>, vector<16x16xf32> -> vector<16x16xf32>
    %cst_49 = arith.constant dense<0xFF800000> : vector<16xf32>
    %76 = vector.multi_reduction <maximumf>, %75, %cst_49 [1] : vector<16x16xf32> to vector<16xf32>
    %77 = vector.shape_cast %76 : vector<16xf32> to vector<16x1xf32>
    %78 = vector.broadcast %77 : vector<16x1xf32> to vector<16x16xf32>
    %79 = arith.subf %75, %78 : vector<16x16xf32>
    %80 = math.exp %79 : vector<16x16xf32>
    %cst_50 = arith.constant dense<0.000000e+00> : vector<16xf32>
    %81 = vector.multi_reduction <add>, %80, %cst_50 [1] : vector<16x16xf32> to vector<16xf32>
    %82 = vector.shape_cast %81 : vector<16xf32> to vector<16x1xf32>
    %c0_51 = arith.constant 0 : index
    %c24_52 = arith.constant 24 : index
    %83 = vector.load %arg10[%c0_51, %c24_52] : memref<16x32xf32, #tpu.memory_space<vmem>>, vector<16x8xf32>
    %cst_53 = arith.constant dense<0.000000e+00> : vector<16x8xf32>
    %84 = tpu.matmul %80, %83, %cst_53 {dimension_numbers = #tpu.dot_dimension_numbers<[1], [0], [0], [1], [0, 0, 1, 1], [], []>} : vector<16x16xf32>, vector<16x8xf32>, vector<16x8xf32> -> vector<16x8xf32>
    %85 = tpu.reciprocal %82 {approx = true} : vector<16x1xf32> -> vector<16x1xf32>
    %86 = vector.broadcast %85 : vector<16x1xf32> to vector<16x8xf32>
    %87 = arith.mulf %84, %86 : vector<16x8xf32>
    %c0_54 = arith.constant 0 : index
    %c24_55 = arith.constant 24 : index
    %88 = vector.load %arg11[%c0_54, %c24_55] : memref<16x32xf32, #tpu.memory_space<vmem>>, vector<16x8xf32>
    tpu.vector_store %arg11[%c0_54, %c24_55], %87 {strides = array<i32>} : memref<16x32xf32, #tpu.memory_space<vmem>>, vector<16x8xf32>,
    %c0_56 = arith.constant 0 : index
    %c0_57 = arith.constant 0 : index
    %89 = vector.load %arg11[%c0_56, %c0_57] : memref<16x32xf32, #tpu.memory_space<vmem>>, vector<16x32xf32>
    %c0_58 = arith.constant 0 : index
    %c0_59 = arith.constant 0 : index
    %90 = vector.load %arg7[%c0_58, %c0_59] : memref<32x32xf32, #tpu.memory_space<vmem>>, vector<32x32xf32>
    %cst_60 = arith.constant dense<0.000000e+00> : vector<16x32xf32>
    %91 = tpu.matmul %89, %90, %cst_60 {dimension_numbers = #tpu.dot_dimension_numbers<[1], [0], [0], [1], [0, 0, 1, 1], [], []>} : vector<16x32xf32>, vector<32x32xf32>, vector<16x32xf32> -> vector<16x32xf32>
    %92 = arith.addf %9, %91 : vector<16x32xf32>
    %c0_61 = arith.constant 0 : index
    %c0_62 = arith.constant 0 : index
    %c0_63 = arith.constant 0 : index
    %93 = vector.load %arg8[%c0_61, %c0_62, %c0_63] : memref<1x16x32xf32, #tpu.memory_space<vmem>>, vector<1x16x32xf32>
    %94 = vector.shape_cast %93 : vector<1x16x32xf32> to vector<16x32xf32>
    %95 = vector.shape_cast %92 : vector<16x32xf32> to vector<1x16x32xf32>
    tpu.vector_store %arg8[%c0_61, %c0_62, %c0_63], %95 {strides = array<i32>} : memref<1x16x32xf32, #tpu.memory_space<vmem>>, vector<1x16x32xf32>,
    return
  }
  func.func @transform_0(%arg0: i32, %arg1: i32) -> (i32, i32, i32) {
    %c0_i32 = arith.constant 0 : i32
    %c0_i32_0 = arith.constant 0 : i32
    return %arg0, %arg1, %c0_i32 : i32, i32, i32
  }
  func.func @transform_1(%arg0: i32, %arg1: i32) -> (i32, i32, i32) {
    %c0_i32 = arith.constant 0 : i32
    %c0_i32_0 = arith.constant 0 : i32
    %c0_i32_1 = arith.constant 0 : i32
    return %arg0, %c0_i32, %c0_i32_0 : i32, i32, i32
  }
  func.func @transform_2(%arg0: i32, %arg1: i32) -> (i32, i32) {
    %c0_i32 = arith.constant 0 : i32
    %c0_i32_0 = arith.constant 0 : i32
    %c0_i32_1 = arith.constant 0 : i32
    return %c0_i32, %c0_i32_0 : i32, i32
  }
  func.func @transform_3(%arg0: i32, %arg1: i32) -> (i32, i32) {
    %c0_i32 = arith.constant 0 : i32
    %c0_i32_0 = arith.constant 0 : i32
    %c0_i32_1 = arith.constant 0 : i32
    return %c0_i32, %c0_i32_0 : i32, i32
  }
  func.func @transform_4(%arg0: i32, %arg1: i32) -> (i32, i32) {
    %c0_i32 = arith.constant 0 : i32
    %c0_i32_0 = arith.constant 0 : i32
    %c0_i32_1 = arith.constant 0 : i32
    return %c0_i32, %c0_i32_0 : i32, i32
  }
  func.func @transform_5(%arg0: i32, %arg1: i32) -> (i32, i32) {
    %c0_i32 = arith.constant 0 : i32
    %c0_i32_0 = arith.constant 0 : i32
    %c0_i32_1 = arith.constant 0 : i32
    return %c0_i32, %c0_i32_0 : i32, i32
  }
  func.func @transform_6(%arg0: i32, %arg1: i32) -> (i32, i32, i32) {
    %c0_i32 = arith.constant 0 : i32
    %c0_i32_0 = arith.constant 0 : i32
    return %arg0, %arg1, %c0_i32 : i32, i32, i32
  }
}

</mosaic_0001>

<bundles_post_ra>
// kernel: tpu_custom_call.1
= control target key start
LH: loop header
LB: loop body
LE: loop exit
PB: predicated region body
PF: predicated region fallthrough
CT: control target
= control target key end

     0   :  { %s2770_s0 = inlined_call_operand.hbm [shape: f32[2,16,32], index: 0, kind: input, shape index: {}]   ;;  %s2771_s1 = inlined_call_operand.hbm [shape: f32[2,16,32], index: 1, kind: input, shape index: {}]   ;;  %s2772_s2 = inlined_call_operand.vmem [shape: f32[1,32], index: 2, kind: input, shape index: {}]   ;;  %s2773_s3 = inlined_call_operand.hbm [shape: f32[32,32], index: 3, kind: input, shape index: {}]   ;;  %s2774_s4 = inlined_call_operand.hbm [shape: f32[32,64], index: 4, kind: input, shape index: {}]   ;;  %s2775_s5 = inlined_call_operand.hbm [shape: f32[32,32], index: 5, kind: input, shape index: {}]   ;;  %s2776_s6 = inlined_call_operand.hbm [shape: f32[2,16,32], index: 6, kind: output, shape index: {}]  }
   0x1   :  { %2786 = sst [smem:[#allocation22_spill]] %s2770_s0 }
   0x2   :  { %2787 = sst [smem:[#allocation23_spill]] %s2773_s3 }
   0x3   :  { %2788 = sst [smem:[#allocation24_spill]] %s2774_s4 }
   0x4   :  { %11 = vsyncpa [#allocation6], 0 }
   0x5   :  { %13 = vsyncpa [#allocation6 + $0x1], 0 }
   0x6   :  { %14 = vsyncpa [#allocation9], 0 }
   0x7   :  { %16 = vsyncpa [#allocation9 + $0x1], 0 }
   0x8   :  { %17 = vsyncpa [#allocation12], 0 }
   0x9   :  { %18 = vsyncpa [#allocation7], 0 }
   0xa   :  { %20 = vsyncpa [#allocation7 + $0x1], 0  ;;  %s2349_s21 = smov 0   ;;  %s2351_s22 = smov 0  }
   0xb   :  { %s2353_s23 = smov 0   ;;  %s2355_s24 = smov 0  }
   0xc   :  { %s2357_s25 = smov 0   ;;  %s2359_s26 = smov 0  }
   0xd LB: > { %2789 = sst [smem:[#allocation20_spill]] %s2276_s21  ;;  %s2380_s27 = sadd.s32 4294967295, %s2296_s26   ;;  %s2296_s26 = sphi %s2359_s26, %s26_s26   ;;  %s2292_s25 = sphi %s2357_s25, %s2818_s25   ;;  %s2288_s24 = sphi %s2355_s24, %s2817_s24   ;;  %s2284_s23 = sphi %s2353_s23, %s2816_s23   ;;  %s2280_s22 = sphi %s2351_s22, %s2815_s22   ;;  %s2276_s21 = sphi %s2349_s21, %s2814_s21  }
   0xe   : > { %s1681_s28 = sadd.s32 4294967294, %s2296_s26   ;;  %p60_p0 = scmp.ne.s32.totalorder %s2280_s22, %s2276_s21 }
   0xf   : > { %p2777_p1 = scmp.eq.s32.totalorder %s2380_s27, 0  ;;  %p202_p3 = scmp.eq.s32.totalorder %s1681_s28, 1 }
  0x10   : > { %p1682_p5 = scmp.ge.s32.totalorder %s2296_s26, 1  ;;  %p209_p7 = scmp.lt.s32.totalorder %s2296_s26, 3 }
  0x11   : > { %p2389_p4 = por %p2777_p1, %p60_p0  ;;  %p2394_p6 = por %p202_p3, %p60_p0 }
  0x12   : > { %p2399_p8 = pnand %p1682_p5, %p209_p7  ;;  %s2298_s8 = smov [#allocation10]  }
  0x13   : > { %s2790_s29 = scalar_select %p2389_p4, 1, 0 }
  0x14   : > { %s2791_s30 = scalar_select %p2394_p6, 1, 0 }
  0x15   : > { %s2793_s7 = scalar_select %p2399_p8, 1, 0 }
  0x16   : > { %2792 = sst [smem:[#allocation21_spill]] %s2791_s30  ;;  %s224_s9 = sshll.u32 %s2298_s8, 4  ;;  %s2403_s9 = int_to_ptr.vmem [resolvable:$true] %s224_s9 }
  0x17   : > { %p1916_p9 = pneg %p2399_p8  ;;  %s2299_s11 = smov [#allocation11]  }
  0x18   : > { %s237_s12 = sshll.u32 %s2299_s11, 4  ;;  %s2300_s13 = smov [#allocation13]   ;;  %s2414_s12 = int_to_ptr.vmem [resolvable:$true] %s237_s12 }
  0x19   : > { %p2410_p11 = pnand %p1916_p9, %p2777_p1  ;;  %s2416_s14 = sshll.u32 %s2300_s13, 4  ;;  %s251_s14 = int_to_ptr.vmem [resolvable:$true] %s2416_s14 }
  0x1a   : > { %s2795_s3 = sld [smem:[#allocation23_spill]] }
  0x1b   : > { %p2426_p13 = pneg %p2410_p11 }
  0x20   : > { %s2058_s17 = scalar_lea.hbm %s2795_s3, 512 }
  0x21   : > { %p2059_p12 = scmp.ne.s32.totalorder %s2795_s3, %s2058_s17  ;;  %p2065_p5 = scmp.lt.u32.totalorder %s2058_s17, %s2795_s3 }
  0x23   : > { %p2061_p0 = pnand %p2426_p13, %p2059_p12 }
  0x25   : > { %p2062_p3 = pneg %p2061_p0 }
  0x27   : > { %p2067_p7 = pnand %p2065_p5, %p2062_p3 }
  0x29   : > { %2070 = shalt.err (!%p2067_p7)
}
  0x2a   : > { %s2071_s11 = scalar_lea.vmem %s2403_s9, 512  ;;  %p2079_p2 = scmp.lt.s32.totalorder %s2403_s9, %s2403_s9 }
  0x2b   : > { %p2072_p9 = scmp.ne.s32.totalorder %s2403_s9, %s2071_s11  ;;  %p2080_p6 = scmp.lt.s32.totalorder %s2071_s11, %s2071_s11 }
  0x2d   : > { %p2074_p10 = pnand %p2072_p9, %p2426_p13  ;;  %p2081_p12 = por %p2080_p6, %p2079_p2 }
  0x2f   : > { %p2075_p1 = pneg %p2074_p10 }
  0x31   : > { %p2082_p0 = pnand %p2081_p12, %p2075_p1 }
  0x33   : > { %2085 = shalt.err (!%p2082_p0)
}
  0x34   : > { %s2782_s13 = smov 128   ;;  %s2784_s15 = smov 8  }
  0x35   : > { %1919 = dma.hbm_to_vmem [thread:$0]  (!%p2410_p11), %s2795_s3, 512, %s2403_s9, [#allocation9], %s2782_s13, %s2782_s13, %s2784_s15  }
  0x36   : > { %s2797_s4 = sld [smem:[#allocation24_spill]] }
  0x3c   : > { %s2086_s28 = scalar_lea.hbm %s2797_s4, 512 }
  0x3d   : > { %p2087_p1 = scmp.ne.s32.totalorder %s2797_s4, %s2086_s28  ;;  %p2093_p10 = scmp.lt.u32.totalorder %s2086_s28, %s2797_s4 }
  0x3f   : > { %p2089_p2 = pnand %p2087_p1, %p2426_p13 }
  0x41   : > { %p2090_p6 = pneg %p2089_p2 }
  0x43   : > { %p2095_p3 = pnand %p2093_p10, %p2090_p6 }
  0x45   : > { %2098 = shalt.err (!%p2095_p3)
}
  0x46   : > { %s2099_s9 = scalar_lea.vmem %s2414_s12, 512  ;;  %p2107_p12 = scmp.lt.s32.totalorder %s2414_s12, %s2414_s12 }
  0x47   : > { %p2100_p5 = scmp.ne.s32.totalorder %s2414_s12, %s2099_s9  ;;  %p2108_p0 = scmp.lt.s32.totalorder %s2099_s9, %s2099_s9 }
  0x49   : > { %p2102_p7 = pnand %p2100_p5, %p2426_p13  ;;  %p2109_p1 = por %p2108_p0, %p2107_p12 }
  0x4b   : > { %p2103_p9 = pneg %p2102_p7 }
  0x4d   : > { %p2110_p2 = pnand %p2109_p1, %p2103_p9 }
  0x4f   : > { %2113 = shalt.err (!%p2110_p2)
}
  0x50   : > { %1922 = dma.hbm_to_vmem [thread:$0]  (!%p2410_p11), %s2797_s4, 512, %s2414_s12, [#allocation12], %s2782_s13, %s2782_s13, %s2784_s15  }
  0x51   : > { %s2114_s18 = scalar_lea.hbm %s2775_s5, 512 }
  0x52   : > { %p2115_p6 = scmp.ne.s32.totalorder %s2775_s5, %s2114_s18  ;;  %p2121_p5 = scmp.lt.u32.totalorder %s2114_s18, %s2775_s5 }
  0x54   : > { %p2117_p10 = pnand %p2115_p6, %p2426_p13 }
  0x56   : > { %p2118_p3 = pneg %p2117_p10 }
  0x58   : > { %p2123_p7 = pnand %p2121_p5, %p2118_p3 }
  0x5a   : > { %2126 = shalt.err (!%p2123_p7)
}
  0x5b   : > { %s2127_s9 = scalar_lea.vmem %s251_s14, 512  ;;  %p2135_p1 = scmp.lt.s32.totalorder %s251_s14, %s251_s14 }
  0x5c   : > { %p2128_p9 = scmp.ne.s32.totalorder %s251_s14, %s2127_s9  ;;  %p2136_p2 = scmp.lt.s32.totalorder %s2127_s9, %s2127_s9 }
  0x5e   : > { %p2130_p12 = pnand %p2128_p9, %p2426_p13  ;;  %p2137_p4 = por %p2136_p2, %p2135_p1 }
  0x60   : > { %p2131_p0 = pneg %p2130_p12 }
  0x62   : > { %p2138_p8 = pnand %p2137_p4, %p2131_p0 }
  0x64   : > { %2141 = shalt.err (!%p2138_p8)
}
  0x65   : > { %1925 = dma.hbm_to_vmem [thread:$0]  (!%p2410_p11), %s2775_s5, 512, %s251_s14, [#allocation12], %s2782_s13, %s2782_s13, %s2784_s15  }
  0x66   : > { %s47_s20 = sadd.s32 1, %s2284_s23  ;;  %s38_s10 = sadd.s32 1, %s2292_s25 }
  0x67   : > { %p54_p4 = scmp.ne.s32.totalorder %s2284_s23, %s2280_s22  ;;  %p40_p8 = scmp.ge.s32.totalorder %s38_s10, 2 }
  0x68   : > { %p55_p13 = scmp.eq.s32.totalorder %s2296_s26, 0  ;;  %p2798_p6 = scmp.eq.s32.totalorder %s2380_s27, 1 }
  0x69   : > { %p1940_p3 = scmp.lt.s32.totalorder %s2296_s26, 2  ;;  %s2820_s10 = smov (%p40_p8, %s38_s10), 0 }
  0x6a   : > { %p2505_p10 = por %p2798_p6, %p54_p4  ;;  %p56_p5 = por %p55_p13, %p54_p4 }
  0x6b   : > { %s264_s16 = sand.u32 1, %s2284_s23   ;;  %s42_s17 = ssub.s32 %s2292_s25, %s2820_s10 }
  0x6c   : > { %p45_p7 = scmp.eq.s32.totalorder %s42_s17, 0  ;;  %s1687_s14 = sshll.u32 %s264_s16, 4 }
  0x6d   : > { %s1728_s18 = sshll.u32 %s2292_s25, 8  ;;  %s2800_s0 = sld [smem:[#allocation22_spill]] }
  0x6e   : > { %s2517_s19 = scalar_select %p45_p7, %s2284_s23, %s47_s20  }
  0x6f   : > { %s268_s9 = scalar_lea.vmem [#allocation5], %s1687_s14  ;;  %p2528_p11 = pnand %p1940_p3, %p56_p5 }
  0x70   : > { %s277_s12 = sshll.u32 %s268_s9, 4  ;;  %s2535_s28 = scalar_lea.hbm %s2771_s1, %s1728_s18  ;;  %s2524_s12 = int_to_ptr.vmem [resolvable:$true] %s277_s12 }
  0x71   : > { %s291_s8 = scalar_lea.vmem [#allocation8], %s1687_s14  ;;  %s2539_s15 = scalar_lea.sflag [#allocation6], %s264_s16 }
  0x72   : > { %s2537_s13 = sshll.u32 %s291_s8, 4  ;;  %p2144_p12 = pneg %p2528_p11  ;;  %s2571_s13 = int_to_ptr.vmem [resolvable:$true] %s2537_s13 }
  0x73   : > { %s2522_s11 = scalar_lea.hbm %s2800_s0, %s1728_s18  ;;  %s2147_s20 = scalar_lea.hbm %s2800_s0, 512 }
  0x74   : > { %s2142_s9 = scalar_lea.hbm %s2522_s11, 256  ;;  %p2148_p2 = scmp.lt.u32.totalorder %s2522_s11, %s2800_s0 }
  0x75   : > { %p2143_p9 = scmp.ne.s32.totalorder %s2522_s11, %s2142_s9  ;;  %p2149_p4 = scmp.lt.u32.totalorder %s2147_s20, %s2142_s9 }
  0x76   : > { %p2151_p13 = scmp.lt.u32.totalorder %s2142_s9, %s2522_s11 }
  0x77   : > { %p2145_p0 = pnand %p2144_p12, %p2143_p9  ;;  %p2150_p8 = por %p2149_p4, %p2148_p2 }
  0x79   : > { %p2146_p1 = pneg %p2145_p0  ;;  %p2152_p6 = por %p2151_p13, %p2150_p8 }
  0x7b   : > { %p2153_p3 = pnand %p2152_p6, %p2146_p1 }
  0x7d   : > { %2156 = shalt.err (!%p2153_p3)
}
  0x7e   : > { %s2157_s16 = scalar_lea.vmem %s2524_s12, 256  ;;  %s2303_s3 = smov [#allocation5]  }
  0x7f   : > { %p2158_p5 = scmp.ne.s32.totalorder %s2524_s12, %s2157_s16  ;;  %s2162_s4 = sshll.u32 %s2303_s3, 4  ;;  %s2163_s4 = int_to_ptr.vmem [resolvable:$false] %s2162_s4 }
  0x80   : > { %s2164_s14 = scalar_lea.vmem %s2163_s4, 512  ;;  %p2165_p0 = scmp.lt.s32.totalorder %s2524_s12, %s2163_s4 }
  0x81   : > { %p2160_p7 = pnand %p2158_p5, %p2144_p12  ;;  %p2166_p2 = scmp.lt.s32.totalorder %s2164_s14, %s2157_s16 }
  0x83   : > { %p2161_p9 = pneg %p2160_p7  ;;  %p2167_p4 = por %p2166_p2, %p2165_p0 }
  0x85   : > { %p2168_p8 = pnand %p2167_p4, %p2161_p9 }
  0x87   : > { %2171 = shalt.err (!%p2168_p8)
}
  0x88   : > { %s2802_s8 = smov 8   ;;  %s2803_s9 = smov 128  }
  0x89   : > { %1929 = dma.hbm_to_vmem [thread:$0]  (!%p2528_p11), %s2522_s11, 256, %s2524_s12, %s2539_s15, %s2803_s9, %s2803_s9, %s2802_s8  }
  0x8a   : > { %s287_s20 = sand.u32 1, %s2296_s26   ;;  %s2172_s18 = scalar_lea.hbm %s2535_s28, 256 }
  0x8b   : > { %s2574_s17 = scalar_lea.sflag [#allocation9], %s287_s20  ;;  %p2173_p1 = scmp.ne.s32.totalorder %s2535_s28, %s2172_s18 }
  0x8c   : > { %s2177_s4 = scalar_lea.hbm %s2771_s1, 512  ;;  %p2178_p3 = scmp.lt.u32.totalorder %s2535_s28, %s2771_s1 }
  0x8d   : > { %p2175_p13 = pnand %p2173_p1, %p2144_p12  ;;  %p2179_p5 = scmp.lt.u32.totalorder %s2177_s4, %s2172_s18 }
  0x8e   : > { %p2181_p9 = scmp.lt.u32.totalorder %s2172_s18, %s2535_s28 }
  0x8f   : > { %p2176_p6 = pneg %p2175_p13  ;;  %p2180_p7 = por %p2179_p5, %p2178_p3 }
  0x91   : > { %p2182_p0 = por %p2181_p9, %p2180_p7 }
  0x93   : > { %p2183_p2 = pnand %p2182_p0, %p2176_p6 }
  0x95   : > { %2186 = shalt.err (!%p2183_p2)
}
  0x96   : > { %s2187_s15 = scalar_lea.vmem %s2571_s13, 256  ;;  %s2304_s11 = smov [#allocation8]  }
  0x97   : > { %p2188_p4 = scmp.ne.s32.totalorder %s2571_s13, %s2187_s15  ;;  %s2192_s12 = sshll.u32 %s2304_s11, 4  ;;  %s2193_s12 = int_to_ptr.vmem [resolvable:$false] %s2192_s12 }
  0x98   : > { %s2194_s0 = scalar_lea.vmem %s2193_s12, 512  ;;  %p2195_p13 = scmp.lt.s32.totalorder %s2571_s13, %s2193_s12 }
  0x99   : > { %p2190_p8 = pnand %p2188_p4, %p2144_p12  ;;  %p2196_p3 = scmp.lt.s32.totalorder %s2194_s0, %s2187_s15 }
  0x9b   : > { %p2191_p1 = pneg %p2190_p8  ;;  %p2197_p5 = por %p2196_p3, %p2195_p13 }
  0x9d   : > { %p2198_p7 = pnand %p2197_p5, %p2191_p1 }
  0x9f   : > { %2201 = shalt.err (!%p2198_p7)
}
  0xa0   : > { %1932 = dma.hbm_to_vmem [thread:$0]  (!%p2528_p11), %s2535_s28, 256, %s2571_s13, %s2574_s17, %s2803_s9, %s2803_s9, %s2802_s8  }
  0xa1   : > { %p2804_p12 = scmp.ne.s32.totalorder %s2793_s7, 0 }
  0xa2   : > { %s2606_s20 = sand.u32 (!%p2804_p12), 1, %s2280_s22   ;;  %p2805_p6 = scmp.ne.s32.totalorder (!%p2804_p12), %s2790_s29, 0 }
  0xa3   : > { %310 = sbr.rel (%p2804_p12) target bundleno = 1723 (0x6bb), region = 44  ;;  %s2609_s18 = sshll.u32 (!%p2804_p12), %s2606_s20, 4 }
  0xa4   : > { %s313_s21 = scalar_lea.sflag (!%p2804_p12), [#allocation6], %s2606_s20  ;;  %s316_s16 = scalar_lea.vmem (!%p2804_p12), [#allocation5], %s2609_s18 }
  0xaa   : > { %2255 = dma.done.wait (%p2805_p6), %s313_s21, 256  }
  0xab   : > { %2257 = vsyncadd (%p2805_p6), %s313_s21, 4294967040  ;;  %s321_s7 = sand.u32 1, %s2380_s27   ;;  %s325_s28 = scalar_lea.vmem [#allocation8], %s2609_s18 }
  0xac   : > { %s322_s13 = scalar_lea.sflag [#allocation9], %s321_s7 }
  0xad   : > { %2259 = dma.done.wait (%p2805_p6), %s322_s13, 256  }
  0xae   : > { %2261 = vsyncadd (%p2805_p6), %s322_s13, 4294967040  ;;  %p2806_p11 = scmp.eq.s32.totalorder %s2380_s27, 0 }
  0xb0   : > { %2263 = dma.done.wait (%p2806_p11), [#allocation9], 512   ;;  %p2807_p9 = pmov %p2806_p11 }
  0xb2   : > { %2265 = vsyncadd (%p2807_p9), [#allocation9], 4294966784  ;;  %p2808_p0 = pmov %p2807_p9 }
  0xb4   : > { %2267 = dma.done.wait (%p2808_p0), [#allocation12], 1024   ;;  %p2809_p2 = pmov %p2808_p0 }
  0xb5   : > { %vm379_vm0 = vcmask 261120   ;;  %v2631_v0 = vld [vmem:[%s316_s16] sm:$0xff]  ;;  %v2633_v1 = vld [vmem:[%s316_s16 + $0x8] sm:$0xff]  ;;  %vm622_vm1 = vcmask 64512   ;;  %s2305_s8 = smov 120   ;;  %s2306_s9 = smov 112  }
  0xb6   : > { %2269 = vsyncadd (%p2809_p2), [#allocation12], 4294966272  ;;  %v510_v2 = vmul.f32 %v2631_v0, %v2631_v0  ;;  %v511_v3 = vmul.f32 %v2633_v1, %v2633_v1  ;;  %v536_v6 = vld [vmem:[#allocation10] sm:$0xff]  ;;  %v537_v7 = vld [vmem:[#allocation10 + $0x8] sm:$0xff]  ;;  %s2307_s17 = smov 96   ;;  %s2308_s3 = smov 104  }
  0xb7   : > { %v538_v8 = vld [vmem:[#allocation10 + $0x10] sm:$0xff]  ;;  %v1866_v9 = vpack.c.bf16 %v537_v7, %v536_v6  ;;  %v539_v10 = vld [vmem:[#allocation10 + $0x18] sm:$0xff]  ;;  %v375_v12 = vld [vmem:[#allocation11] sm:$0xff]  ;;  %vm493_vm2 = vcmask 130048   ;;  %s2309_s4 = smov 8   ;;  %s2310_s14 = smov 16  }
  0xb8   : > { %v512_v4 = vsel %vm379_vm0, %v510_v2, 0.0  ;;  %v515_v5 = vsel %vm379_vm0, %v511_v3, 0.0  ;;  %v1870_v11 = vpack.c.bf16 %v539_v10, %v538_v8  ;;  %v376_v13 = vld [vmem:[#allocation11 + $0x8] sm:$0xff]  ;;  %v377_v14 = vld [vmem:[#allocation11 + $0x10] sm:$0xff]  ;;  %v378_v16 = vld [vmem:[#allocation11 + $0x18] sm:$0xff]  ;;  %s2311_s15 = smov 24  }
  0xb9   : > { %513 = vadd.xlane.f32.xlu0 %v512_v4  ;;  %1867 = vmatprep.subr.bf16.mxu1 %v1866_v9  ;;  %v1858_v15 = vpack.c.bf16 %v376_v13, %v375_v12  ;;  %v373_v17 = vld [vmem:[%s325_s28] sm:$0xff]  ;;  %v1862_v18 = vpack.c.bf16 %v378_v16, %v377_v14  ;;  %v374_v19 = vld [vmem:[%s325_s28 + $0x8] sm:$0xff]  ;;  %vm1016_vm3 = vcmask 130112   ;;  %vm1224_vm4 = vcmask 195712   ;;  %s370_s11 = scalar_lea.vmem [#allocation14], %s2609_s18  ;;  %s1730_s0 = sshll.u32 %s2288_s24, 8 }
  0xba   : > { %1869 = vmatpush3.bf16.msra.mxu1 %v1866_v9  ;;  %1785 = vmatprep.mubr.msk.f32.mxu0 %vm379_vm0, %v373_v17  ;;  %v1702_v27 = vld [vmem:[%s2772_s2] ss:$0 sm:$0xff]  ;;  %vm1432_vm5 = vcmask 261312   ;;  %s1542_s12 = sshll.u32 %s370_s11, 4  ;;  %s2718_s7 = scalar_lea.hbm %s2776_s6, %s1730_s0  ;;  %s2712_s12 = int_to_ptr.vmem [resolvable:$true] %s1542_s12 }
  0xbb   : > { %1871 = vmatprep.subr.bf16.mxu1 %v1870_v11  ;;  %1859 = vmatprep.subr.bf16.mxu0 %v1858_v15  ;;  %s1527_s24 = scalar_lea.sflag [#allocation7], %s2606_s20  ;;  %s2202_s18 = scalar_lea.vmem %s2712_s12, 256 }
  0xbc   : > { %1861 = vmatpush3.bf16.msra.mxu0 %v1858_v15  ;;  %p2203_p4 = scmp.ne.s32.totalorder %s2712_s12, %s2202_s18  ;;  %s2312_s13 = smov [#allocation14]  }
  0xbd   : > { %516 = vadd.xlane.f32.xlu0 %v515_v5  ;;  %1863 = vmatprep.subr.bf16.mxu0 %v1862_v18  ;;  %s2206_s28 = sshll.u32 %s2312_s13, 4  ;;  %s2207_s28 = int_to_ptr.vmem [resolvable:$false] %s2206_s28 }
  0xbe   : > { %1873 = vmatpush3.bf16.msra.mxu1 %v1870_v11  ;;  %p2204_p8 = pnand %p2203_p4, %p2505_p10  ;;  %s2208_s27 = scalar_lea.vmem %s2207_s28, 512 }
  0xbf   : > { %p2209_p13 = scmp.lt.s32.totalorder %s2712_s12, %s2207_s28  ;;  %p2210_p3 = scmp.lt.s32.totalorder %s2208_s27, %s2202_s18 }
  0xc0   : > { %1865 = vmatpush3.bf16.msra.mxu0 %v1862_v18  ;;  %p2205_p1 = pneg %p2204_p8 }
  0xc1   : > { %p2211_p5 = por %p2210_p3, %p2209_p13 }
  0xc3   : > { %1786 = vmatmul.mubr.msk.f32.vlgmr.msra.gmra.mrb[0].mxu0 %vm379_vm0, %v374_v19  ;;  %p2212_p7 = pnand %p2211_p5, %p2205_p1 }
 0x146   : > { %v514_v20 = vpop.xlane.xlu0 %513 }
 0x147   : > { %v519_v21 = vmul.f32 0.03125, %v514_v20 }
 0x149   : > { %v521_v22 = vadd.f32 1e-06, %v519_v21 }
 0x14a   : > { %v517_v23 = vpop.xlane.xlu0 %516 }
 0x14b   : > { %2022 = vrsqrt.f32 %v521_v22  ;;  %v520_v24 = vmul.f32 0.03125, %v517_v23 }
 0x14d   : > { %v522_v25 = vadd.f32 1e-06, %v520_v24 }
 0x14f   : > { %2024 = vrsqrt.f32 %v522_v25 }
 0x155   : > { %v2023_v26 = vpop.eup %2022 }
 0x156   : > { %v525_v28 = vmul.f32 %v2023_v26, %v2631_v0 }
 0x158   : > { %v534_v29 = vmul.f32 %v1702_v27, %v525_v28 }
 0x159   : > { %v2025_v30 = vpop.eup %2024 }
 0x15a   : > { %v526_v31 = vmul.f32 %v2025_v30, %v2633_v1  ;;  %1796 = vmatprep.mubr.msk.f32.mxu1 %vm379_vm0, %v534_v29 }
 0x15c   : > { %v535_v32 = vmul.f32 %v1702_v27, %v526_v31 }
 0x15e   : > { %1797 = vmatmul.mubr.msk.f32.vlgmr.msra.gmra.mrb[0].mxu1 %vm379_vm0, %v535_v32 }
 0x196   : > { %v1787_v33 = vpop.f32.mrb[0].mxu0 }
 0x197   : > { %v452_v34 = vpop.f32.mrb[1].mxu0 }
 0x231   : > { %v1798_v35 = vpop.f32.mrb[0].mxu1 }
 0x232   : > { %814 = vrot.lane.b32.xlu1 %v1798_v35, %s2305_s8  ;;  %v612_v36 = vpop.f32.mrb[1].mxu1 }
 0x233   : > { %1020 = vrot.lane.b32.xlu0 %v612_v36, %s2306_s9  ;;  %1801 = vmatprep.mubr.msk.f32.mxu1 %vm622_vm1, %v612_v36 }
 0x236   : > { %812 = vrot.lane.b32.xlu1 %v612_v36, %s2305_s8 }
 0x237   : > { %500 = vrot.lane.b32.xlu0 %v452_v34, %s2307_s17 }
 0x23a   : > { %1022 = vrot.lane.b32.xlu1 %v1798_v35, %s2306_s9 }
 0x23b   : > { %502 = vrot.lane.b32.xlu0 %v1787_v33, %s2307_s17 }
 0x23e   : > { %1230 = vrot.lane.b32.xlu1 %v1798_v35, %s2308_s3 }
 0x242   : > { %1228 = vrot.lane.b32.xlu1 %v612_v36, %s2308_s3 }
 0x26b   : > { %461 = vxpose.xlu1.b32.start [1/2] (short) (narrow) %v452_v34, 32 }
 0x26f   : > { %462 = vxpose.xlu1.b32.end [2/2] (short) (narrow) %v1787_v33, 32 }
 0x2a4   : > { %v815_v37 = vpop.permute.xlu1 %814 }
 0x2a5   : > { %v1021_v38 = vpop.permute.xlu0 %1020 }
 0x2a8   : > { %v813_v39 = vpop.permute.xlu1 %812 }
 0x2a9   : > { %1813 = vmatprep.mubr.msk.f32.mxu0 %vm622_vm1, %v813_v39  ;;  %v501_v40 = vpop.permute.xlu0 %500 }
 0x2aa   : > { %506 = vst.msk [vmem:[#allocation3] sm:$0xff] %vm379_vm0, %v501_v40 }
 0x2ac   : > { %v1023_v45 = vpop.permute.xlu1 %1022 }
 0x2ad   : > { %v503_v41 = vpop.permute.xlu0 %502 }
 0x2ae   : > { %507 = vst.msk [vmem:[#allocation3 + $0x8] sm:$0xff] %vm379_vm0, %v503_v41 }
 0x2b0   : > { %v1231_v46 = vpop.permute.xlu1 %1230 }
 0x2b1   : > { %v913_v42 = vld [vmem:[#allocation3] sm:$0xff] }
 0x2b4   : > { %v1229_v47 = vpop.permute.xlu1 %1228 }
 0x2b5   : > { %v914_v43 = vld [vmem:[#allocation3 + $0x8] sm:$0xff] }
 0x2b6   : > { %v2662_v44 = vpack.i.bf16 %v914_v43, %v913_v42  ;;  %v1874_v52 = vpack.c.bf16 %v914_v43, %v913_v42 }
 0x2b8   : > { %2008 = vrot.lane.b32.xlu0 %v2662_v44, %s2305_s8 }
 0x2eb   : > { %v477_v48 = vpop.trf.xlu1 }
 0x2ec   : > { %494 = vst.msk [vmem:[#allocation2] sm:$0xff] %vm493_vm2, %v477_v48 }
 0x2ef   : > { %v478_v49 = vpop.trf.xlu1 }
 0x2f0   : > { %495 = vst.msk [vmem:[#allocation2 + $0x8] sm:$0xff] %vm493_vm2, %v478_v49 }
 0x2f3   : > { %v479_v50 = vpop.trf.xlu1  ;;  %v621_v51 = vld [vmem:[#allocation2] sm:$0xff] }
 0x2f4   : > { %496 = vst.msk [vmem:[#allocation2 + $0x10] sm:$0xff] %vm493_vm2, %v479_v50  ;;  %1799 = vmatprep.subr.mxu1 %v621_v51 }
 0x2f5   : > { %1800 = vmatpush3.msra.mxu1 %v621_v51 }
 0x2f6   : > { %1802 = vmatmul.mubr.msk.f32.vlgmr.msra.gmra.mrb[2].mxu1 %vm622_vm1, %v1798_v35  ;;  %1875 = vmatprep.subr.bf16.mxu1 %v1874_v52 }
 0x2f7   : > { %1877 = vmatpush3.bf16.msra.mxu1 %v1874_v52  ;;  %v480_v53 = vpop.trf.xlu1  ;;  %v811_v54 = vld [vmem:[#allocation2 + $0x8] sm:$0xff] }
 0x2f8   : > { %497 = vst.msk [vmem:[#allocation2 + $0x18] sm:$0xff] %vm493_vm2, %v480_v53  ;;  %1811 = vmatprep.subr.mxu0 %v811_v54 }
 0x2f9   : > { %1812 = vmatpush3.msra.mxu0 %v811_v54 }
 0x2fa   : > { %1814 = vmatmul.mubr.msk.f32.vlgmr.msra.gmra.mrb[2].mxu0 %vm622_vm1, %v815_v37 }
 0x2fb   : > { %1825 = vmatprep.mubr.msk.f32.mxu0 %vm622_vm1, %v1021_v38  ;;  %v1019_v55 = vld [vmem:[#allocation2 + $0x10] sm:$0xff] }
 0x2fc   : > { %1823 = vmatprep.subr.mxu0 %v1019_v55 }
 0x2fd   : > { %1824 = vmatpush3.msra.mxu0 %v1019_v55 }
 0x2fe   : > { %1826 = vmatmul.mubr.msk.f32.vlgmr.msra.gmra.mrb[4].mxu0 %vm622_vm1, %v1023_v45 }
 0x2ff   : > { %1837 = vmatprep.mubr.msk.f32.mxu0 %vm622_vm1, %v1229_v47  ;;  %v1227_v56 = vld [vmem:[#allocation2 + $0x18] sm:$0xff] }
 0x300   : > { %1835 = vmatprep.subr.mxu0 %v1227_v56 }
 0x301   : > { %1836 = vmatpush3.msra.mxu0 %v1227_v56 }
 0x302   : > { %1838 = vmatmul.mubr.msk.f32.vlgmr.msra.gmra.mrb[6].mxu0 %vm622_vm1, %v1231_v46 }
 0x32a   : > { %v2009_v57 = vpop.permute.xlu0 %2008 }
 0x32b   : > { %v2011_v58 = vunpack.i.h.bf16 %v2009_v57  ;;  %v2010_v59 = vunpack.i.l.bf16 %v2009_v57 }
 0x32d   : > { %v1878_v60 = vpack.c.bf16 %v2011_v58, %v2010_v59 }
 0x32f   : > { %1879 = vmatprep.subr.bf16.mxu1 %v1878_v60 }
 0x3c9   : > { %v1803_v61 = vpop.f32.mrb[2].mxu1 }
 0x3ca   : > { %v695_v62 = vpop.f32.mrb[3].mxu1  ;;  %v707_v63 = vsel %vm493_vm2, %v1803_v61, -inf }
 0x3cb   : > { %708 = vmax.xlane.f32.xlu1 %v707_v63  ;;  %v704_v2 = vsel %vm493_vm2, %v695_v62, -inf }
 0x3cc   : > { %705 = vmax.xlane.f32.xlu0 %v704_v2 }
 0x3cd   : > { %v1815_v3 = vpop.f32.mrb[2].mxu0 }
 0x3ce   : > { %v886_v4 = vpop.f32.mrb[3].mxu0  ;;  %v898_v5 = vsel %vm493_vm2, %v1815_v3, -inf }
 0x3cf   : > { %v895_v8 = vsel %vm493_vm2, %v886_v4, -inf }
 0x3d0   : > { %899 = vmax.xlane.f32.xlu0 %v898_v5 }
 0x3d1   : > { %v1827_v6 = vpop.f32.mrb[4].mxu0 }
 0x3d2   : > { %v1094_v7 = vpop.f32.mrb[5].mxu0  ;;  %v1106_v11 = vsel %vm493_vm2, %v1827_v6, -inf }
 0x3d3   : > { %v1103_v12 = vsel %vm493_vm2, %v1094_v7, -inf }
 0x3d4   : > { %896 = vmax.xlane.f32.xlu0 %v895_v8 }
 0x3d5   : > { %v1839_v9 = vpop.f32.mrb[6].mxu0 }
 0x3d6   : > { %v1302_v10 = vpop.f32.mrb[7].mxu0  ;;  %v1314_v13 = vsel %vm493_vm2, %v1839_v9, -inf }
 0x3d7   : > { %v1311_v14 = vsel %vm493_vm2, %v1302_v10, -inf }
 0x3d8   : > { %1107 = vmax.xlane.f32.xlu0 %v1106_v11 }
 0x3dc   : > { %2013 = vrot.lane.b32.xlu1 %v2662_v44, %s2306_s9  ;;  %1104 = vmax.xlane.f32.xlu0 %v1103_v12 }
 0x3e0   : > { %1315 = vmax.xlane.f32.xlu0 %v1314_v13 }
 0x3e4   : > { %1312 = vmax.xlane.f32.xlu0 %v1311_v14 }
 0x3fa   : > { %2018 = vrot.lane.b32.xlu0 %v2662_v44, %s2308_s3 }
 0x458   : > { %v709_v15 = vpop.xlane.xlu1 %708 }
 0x459   : > { %v711_v16 = vsub.f32 %v1803_v61, %v709_v15  ;;  %v706_v17 = vpop.xlane.xlu0 %705 }
 0x45a   : > { %v710_v18 = vsub.f32 %v695_v62, %v706_v17 }
 0x45b   : > { %v714_v19 = vmul.f32 1.442695, %v711_v16 }
 0x45c   : > { %v712_v20 = vmul.f32 1.442695, %v710_v18  ;;  %v2014_v26 = vpop.permute.xlu1 %2013 }
 0x45d   : > { %v900_v21 = vpop.xlane.xlu0 %899  ;;  %v2016_v29 = vunpack.i.h.bf16 %v2014_v26  ;;  %v2015_v30 = vunpack.i.l.bf16 %v2014_v26 }
 0x45e   : > { %2026 = vpow2.f32 %v712_v20  ;;  %v902_v22 = vsub.f32 %v1815_v3, %v900_v21  ;;  %v1437_v21 = vld [vmem:[#allocation13] sm:$0xff] }
 0x45f   : > { %2028 = vpow2.f32 %v714_v19  ;;  %v1882_v36 = vpack.c.bf16 %v2016_v29, %v2015_v30 }
 0x460   : > { %v905_v23 = vmul.f32 1.442695, %v902_v22  ;;  %v1438_v22 = vld [vmem:[#allocation13 + $0x8] sm:$0xff] }
 0x461   : > { %v897_v24 = vpop.xlane.xlu0 %896  ;;  %v1890_v26 = vpack.c.bf16 %v1438_v22, %v1437_v21 }
 0x462   : > { %2030 = vpow2.f32 %v905_v23  ;;  %v901_v25 = vsub.f32 %v886_v4, %v897_v24  ;;  %v1439_v23 = vld [vmem:[#allocation13 + $0x10] sm:$0xff] }
 0x463   : > { %1891 = vmatprep.subr.bf16.mxu0 %v1890_v26 }
 0x464   : > { %v903_v27 = vmul.f32 1.442695, %v901_v25  ;;  %1893 = vmatpush3.bf16.msra.mxu0 %v1890_v26 }
 0x465   : > { %v1108_v28 = vpop.xlane.xlu0 %1107 }
 0x466   : > { %2032 = vpow2.f32 %v903_v27  ;;  %v1110_v31 = vsub.f32 %v1827_v6, %v1108_v28  ;;  %v1440_v27 = vld [vmem:[#allocation13 + $0x18] sm:$0xff] }
 0x467   : > { %v1894_v30 = vpack.c.bf16 %v1440_v27, %v1439_v23 }
 0x468   : > { %v2027_v32 = vpop.eup %2026  ;;  %v1113_v33 = vmul.f32 1.442695, %v1110_v31 }
 0x469   : > { %v2029_v34 = vpop.eup %2028  ;;  %1808 = vmatprep.mubr.msk.f32.mxu1 %vm493_vm2, %v2027_v32  ;;  %v1105_v35 = vpop.xlane.xlu0 %1104  ;;  %v716_v45 = vsel %vm493_vm2, %v2027_v32, 0.0  ;;  %1895 = vmatprep.subr.bf16.mxu0 %v1894_v30 }
 0x46a   : > { %2034 = vpow2.f32 %v1113_v33  ;;  %v1109_v37 = vsub.f32 %v1094_v7, %v1105_v35  ;;  %1809 = vmatmul.mubr.msk.f32.vlgmr.msra.gmra.mrb[4].mxu1 %vm493_vm2, %v2029_v34  ;;  %v719_v62 = vsel %vm493_vm2, %v2029_v34, 0.0  ;;  %1897 = vmatpush3.bf16.msra.mxu0 %v1894_v30 }
 0x46b   : > { %1881 = vmatpush3.bf16.msra.mxu1 %v1878_v60 }
 0x46c   : > { %v2031_v38 = vpop.eup %2030  ;;  %v1111_v39 = vmul.f32 1.442695, %v1109_v37  ;;  %1883 = vmatprep.subr.bf16.mxu1 %v1882_v36 }
 0x46d   : > { %v1316_v40 = vpop.xlane.xlu0 %1315  ;;  %v910_v41 = vsel %vm493_vm2, %v2031_v38, 0.0 }
 0x46e   : > { %2036 = vpow2.f32 %v1111_v39  ;;  %911 = vadd.xlane.f32.xlu1 %v910_v41  ;;  %v1318_v42 = vsub.f32 %v1839_v9, %v1316_v40 }
 0x470   : > { %v2033_v43 = vpop.eup %2032  ;;  %v1321_v48 = vmul.f32 1.442695, %v1318_v42 }
 0x471   : > { %v1313_v44 = vpop.xlane.xlu0 %1312  ;;  %1820 = vmatprep.mubr.msk.f32.mxu1 %vm493_vm2, %v2033_v43  ;;  %v907_v46 = vsel %vm493_vm2, %v2033_v43, 0.0 }
 0x472   : > { %v1317_v47 = vsub.f32 %v1302_v10, %v1313_v44  ;;  %717 = vadd.xlane.f32.xlu1 %v716_v45  ;;  %908 = vadd.xlane.f32.xlu0 %v907_v46 }
 0x473   : > { %1821 = vmatmul.mubr.msk.f32.vlgmr.msra.gmra.mrb[6].mxu1 %vm493_vm2, %v2031_v38 }
 0x474   : > { %v2035_v49 = vpop.eup %2034  ;;  %v1319_v50 = vmul.f32 1.442695, %v1317_v47  ;;  %1885 = vmatpush3.bf16.msra.mxu1 %v1882_v36 }
 0x475   : > { %v2019_v51 = vpop.permute.xlu0 %2018  ;;  %v1118_v52 = vsel %vm493_vm2, %v2035_v49, 0.0 }
 0x476   : > { %2038 = vpow2.f32 %v1319_v50  ;;  %v2021_v53 = vunpack.i.h.bf16 %v2019_v51  ;;  %v2020_v54 = vunpack.i.l.bf16 %v2019_v51  ;;  %1119 = vadd.xlane.f32.xlu0 %v1118_v52 }
 0x477   : > { %2040 = vpow2.f32 %v1321_v48 }
 0x478   : > { %v2037_v55 = vpop.eup %2036  ;;  %v1886_v56 = vpack.c.bf16 %v2021_v53, %v2020_v54 }
 0x479   : > { %1832 = vmatprep.mubr.msk.f32.mxu1 %vm493_vm2, %v2037_v55  ;;  %v1115_v57 = vsel %vm493_vm2, %v2037_v55, 0.0 }
 0x47a   : > { %1116 = vadd.xlane.f32.xlu0 %v1115_v57  ;;  %1833 = vmatmul.mubr.msk.f32.vlgmr.msra.gmra.mrb[8].mxu1 %vm493_vm2, %v2035_v49 }
 0x47b   : > { %1887 = vmatprep.subr.bf16.mxu1 %v1886_v56 }
 0x47c   : > { %1889 = vmatpush3.bf16.msra.mxu1 %v1886_v56 }
 0x480   : > { %v2039_v58 = vpop.eup %2038 }
 0x481   : > { %v2041_v59 = vpop.eup %2040  ;;  %1844 = vmatprep.mubr.msk.f32.mxu1 %vm493_vm2, %v2039_v58  ;;  %v1323_v60 = vsel %vm493_vm2, %v2039_v58, 0.0 }
 0x482   : > { %1324 = vadd.xlane.f32.xlu0 %v1323_v60  ;;  %1845 = vmatmul.mubr.msk.f32.vlgmr.msra.gmra.mrb[10].mxu1 %vm493_vm2, %v2041_v59  ;;  %v1326_v61 = vsel %vm493_vm2, %v2041_v59, 0.0 }
 0x486   : > { %1327 = vadd.xlane.f32.xlu0 %v1326_v61 }
 0x48a   : > { %720 = vadd.xlane.f32.xlu0 %v719_v62 }
 0x4fb   : > { %v912_v6 = vpop.xlane.xlu1 %911 }
 0x4ff   : > { %v909_v63 = vpop.xlane.xlu0 %908  ;;  %v718_v8 = vpop.xlane.xlu1 %717 }
 0x503   : > { %v1120_v2 = vpop.xlane.xlu0 %1119 }
 0x507   : > { %v1117_v3 = vpop.xlane.xlu0 %1116 }
 0x50f   : > { %v1325_v4 = vpop.xlane.xlu0 %1324 }
 0x513   : > { %v1328_v5 = vpop.xlane.xlu0 %1327 }
 0x517   : > { %v721_v7 = vpop.xlane.xlu0 %720 }
 0x518   : > { %2042 = vrcp.f32 %v721_v7 }
 0x519   : > { %2044 = vrcp.f32 %v718_v8 }
 0x51a   : > { %2046 = vrcp.f32 %v912_v6 }
 0x51b   : > { %2048 = vrcp.f32 %v909_v63 }
 0x51c   : > { %2050 = vrcp.f32 %v1120_v2 }
 0x51d   : > { %2052 = vrcp.f32 %v1117_v3 }
 0x51e   : > { %2054 = vrcp.f32 %v1328_v5 }
 0x51f   : > { %2056 = vrcp.f32 %v1325_v4 }
 0x522   : > { %v2043_v9 = vpop.eup %2042 }
 0x523   : > { %v2045_v11 = vpop.eup %2044 }
 0x524   : > { %v2047_v15 = vpop.eup %2046 }
 0x525   : > { %v2049_v17 = vpop.eup %2048 }
 0x526   : > { %v2051_v24 = vpop.eup %2050 }
 0x527   : > { %v2053_v31 = vpop.eup %2052 }
 0x528   : > { %v2055_v33 = vpop.eup %2054 }
 0x529   : > { %v2057_v35 = vpop.eup %2056 }
 0x53d   : > { %v1810_v10 = vpop.f32.mrb[4].mxu1 }
 0x53e   : > { %v808_v12 = vmul.f32 %v2043_v9, %v1810_v10  ;;  %v796_v13 = vpop.f32.mrb[5].mxu1 }
 0x53f   : > { %v807_v14 = vmul.f32 %v2045_v11, %v796_v13 }
 0x540   : > { %810 = vst.msk [vmem:[#allocation4 + $0x8] sm:$0xff] %vm622_vm1, %v808_v12 }
 0x541   : > { %809 = vst.msk [vmem:[#allocation4] sm:$0xff] %vm622_vm1, %v807_v14 }
 0x546   : > { %v1822_v16 = vpop.f32.mrb[6].mxu1 }
 0x547   : > { %v1007_v18 = vmul.f32 %v2047_v15, %v1822_v16  ;;  %v995_v19 = vpop.f32.mrb[7].mxu1 }
 0x548   : > { %v1006_v20 = vmul.f32 %v2049_v17, %v995_v19 }
 0x549   : > { %1012 = vrot.lane.b32.xlu0 %v1007_v18, %s2309_s4 }
 0x54a   : > { %1010 = vrot.lane.b32.xlu1 %v1006_v20, %s2309_s4 }
 0x54d   : > { %v1834_v25 = vpop.f32.mrb[8].mxu1 }
 0x54e   : > { %v1215_v28 = vmul.f32 %v2051_v24, %v1834_v25  ;;  %v1203_v29 = vpop.f32.mrb[9].mxu1 }
 0x54f   : > { %v1214_v32 = vmul.f32 %v2053_v31, %v1203_v29 }
 0x550   : > { %1220 = vrot.lane.b32.xlu1 %v1215_v28, %s2310_s14 }
 0x554   : > { %1218 = vrot.lane.b32.xlu1 %v1214_v32, %s2310_s14 }
 0x555   : > { %v1846_v34 = vpop.f32.mrb[10].mxu1 }
 0x556   : > { %v1423_v36 = vmul.f32 %v2055_v33, %v1846_v34  ;;  %v1411_v37 = vpop.f32.mrb[11].mxu1 }
 0x557   : > { %v1422_v38 = vmul.f32 %v2057_v35, %v1411_v37 }
 0x558   : > { %1428 = vrot.lane.b32.xlu1 %v1423_v36, %s2311_s15 }
 0x559   : > { %1426 = vrot.lane.b32.xlu0 %v1422_v38, %s2311_s15 }
 0x5bb   : > { %v1013_v39 = vpop.permute.xlu0 %1012 }
 0x5bc   : > { %1018 = vst.msk [vmem:[#allocation4 + $0x8] sm:$0xff] %vm1016_vm3, %v1013_v39  ;;  %v1011_v40 = vpop.permute.xlu1 %1010 }
 0x5bd   : > { %1017 = vst.msk [vmem:[#allocation4] sm:$0xff] %vm1016_vm3, %v1011_v40 }
 0x5c2   : > { %v1221_v41 = vpop.permute.xlu1 %1220 }
 0x5c3   : > { %1226 = vst.msk [vmem:[#allocation4 + $0x8] sm:$0xff] %vm1224_vm4, %v1221_v41 }
 0x5c6   : > { %v1219_v42 = vpop.permute.xlu1 %1218 }
 0x5c7   : > { %1225 = vst.msk [vmem:[#allocation4] sm:$0xff] %vm1224_vm4, %v1219_v42 }
 0x5ca   : > { %v1429_v43 = vpop.permute.xlu1 %1428 }
 0x5cb   : > { %1434 = vst.msk [vmem:[#allocation4 + $0x8] sm:$0xff] %vm1432_vm5, %v1429_v43  ;;  %v1427_v44 = vpop.permute.xlu0 %1426 }
 0x5cc   : > { %1433 = vst.msk [vmem:[#allocation4] sm:$0xff] %vm1432_vm5, %v1427_v44 }
 0x5d2   : > { %v1436_v46 = vld [vmem:[#allocation4 + $0x8] sm:$0xff] }
 0x5d3   : > { %v1435_v45 = vld [vmem:[#allocation4] sm:$0xff] }
 0x5d4   : > { %1855 = vmatprep.mubr.msk.f32.mxu0 %vm379_vm0, %v1435_v45 }
 0x5d5   : > { %1856 = vmatmul.mubr.msk.f32.vlgmr.msra.gmra.mrb[8].mxu0 %vm379_vm0, %v1436_v46 }
 0x6a8   : > { %v1857_v47 = vpop.f32.mrb[8].mxu0 }
 0x6a9   : > { %v1523_v48 = vadd.f32 %v1857_v47, %v2633_v1  ;;  %v1513_v49 = vpop.f32.mrb[9].mxu0 }
 0x6aa   : > { %v1522_v50 = vadd.f32 %v1513_v49, %v2631_v0 }
 0x6ab   : > { %1525 = vst.msk [vmem:[%s370_s11 + $0x8] sm:$0xff] %vm379_vm0, %v1523_v48 }
 0x6ac   : > { %1524 = vst.msk [vmem:[%s370_s11] sm:$0xff] %vm379_vm0, %v1522_v50 }
 0x6ad   : > { %2215 = shalt.err (!%p2212_p7)
}
 0x6ae   : > { %s2216_s29 = scalar_lea.hbm %s2718_s7, 256  ;;  %s2220_s17 = scalar_lea.hbm %s2776_s6, 512 }
 0x6af   : > { %p2217_p12 = scmp.ne.s32.totalorder %s2718_s7, %s2216_s29  ;;  %p2221_p9 = scmp.lt.u32.totalorder %s2718_s7, %s2776_s6 }
 0x6b0   : > { %p2222_p0 = scmp.lt.u32.totalorder %s2220_s17, %s2216_s29  ;;  %p2224_p4 = scmp.lt.u32.totalorder %s2216_s29, %s2718_s7 }
 0x6b1   : > { %p2218_p6 = pnand %p2217_p12, %p2505_p10 }
 0x6b2   : > { %p2223_p2 = por %p2222_p0, %p2221_p9 }
 0x6b3   : > { %p2219_p11 = pneg %p2218_p6 }
 0x6b4   : > { %p2225_p8 = por %p2224_p4, %p2223_p2 }
 0x6b6   : > { %p2226_p1 = pnand %p2225_p8, %p2219_p11 }
 0x6b8   : > { %2229 = shalt.err (!%p2226_p1)
}
 0x6b9   : > { %s2313_s15 = smov 128  }
 0x6ba   : > { %1914 = dma.vmem_to_hbm [thread:$0]  (%p2505_p10), %s2712_s12, 256, %s2718_s7, %s1527_s24, %s2313_s15, %s2313_s15, %s2309_s4  }
 0x6bb PF: > { %s2810_s11 = sld [smem:[#allocation20_spill]]  ;;  %s2811_s0 = sld [smem:[#allocation21_spill]] }
 0x6bc   : > { %p2813_p3 = scmp.ge.s32.totalorder %s2296_s26, 2 }
 0x6c1   : > { %s1557_s21 = sand.u32 1, %s2810_s11   ;;  %p2812_p13 = scmp.ne.s32.totalorder %s2811_s0, 0 }
 0x6c2   : > { %s1558_s16 = scalar_lea.sflag [#allocation7], %s1557_s21 }
 0x6c3   : > { %p1934_p5 = pnand %p2813_p3, %p2812_p13 }
 0x6c5   : > { %2271 = dma.done.wait (!%p1934_p5), %s1558_s16, 256  }
 0x6c6   : > { %2273 = vsyncadd (!%p1934_p5), %s1558_s16, 4294967040  ;;  %s26_s26 = sadd.s32 1, %s2296_s26   ;;  %s2814_s21 = smov %s2280_s22 }
 0x6c7   : > { %p23_p7 = scmp.ge.s32.totalorder %s26_s26, 4   ;;  %s2815_s22 = smov %s2284_s23 }
 0x6c8   : > { %s2816_s23 = smov %s2517_s19  ;;  %s2817_s24 = smov %s2292_s25 }
 0x6c9   : > { %s2818_s25 = smov %s2820_s10  ;;  %25 = sbr.rel (!%p23_p7) target bundleno = 13 (0xd), region = 114 }
 0x6d0   :  { %1563 = vsyncpa [#allocation6], 1 }
 0x6d1   :  { %1565 = vsyncpa [#allocation6 + $0x1], 1 }
 0x6d2   :  { %1566 = vsyncpa [#allocation9], 1 }
 0x6d3   :  { %1568 = vsyncpa [#allocation9 + $0x1], 1 }
 0x6d4   :  { %1569 = vsyncpa [#allocation12], 1 }
 0x6d5   :  { %1570 = vsyncpa [#allocation7], 1 }
 0x6d6   :  { %1572 = vsyncpa [#allocation7 + $0x1], 1 }

// kernel: tpu_custom_call.1
= control target key start
LH: loop header
LB: loop body
LE: loop exit
PB: predicated region body
PF: predicated region fallthrough
CT: control target
= control target key end

     0   :  { %s2878_s0 = inlined_call_operand.hbm [shape: f32[2,16,32], index: 0, kind: input, shape index: {}]   ;;  %s2879_s1 = inlined_call_operand.hbm [shape: f32[2,16,32], index: 1, kind: input, shape index: {}]   ;;  %s2880_s2 = inlined_call_operand.vmem [shape: f32[1,32], index: 2, kind: input, shape index: {}]   ;;  %s2881_s3 = inlined_call_operand.hbm [shape: f32[32,32], index: 3, kind: input, shape index: {}]   ;;  %s2882_s4 = inlined_call_operand.hbm [shape: f32[32,64], index: 4, kind: input, shape index: {}]   ;;  %s2883_s5 = inlined_call_operand.hbm [shape: f32[32,32], index: 5, kind: input, shape index: {}]   ;;  %s2884_s6 = inlined_call_operand.hbm [shape: f32[2,16,32], index: 6, kind: output, shape index: {}]  }
   0x1   :  { %2894 = sst [smem:[#allocation22_spill]] %s2878_s0 }
   0x2   :  { %2895 = sst [smem:[#allocation23_spill]] %s2881_s3 }
   0x3   :  { %2896 = sst [smem:[#allocation24_spill]] %s2882_s4 }
   0x4   :  { %11 = vsyncpa [#allocation6], 0 }
   0x5   :  { %13 = vsyncpa [#allocation6 + $0x1], 0 }
   0x6   :  { %14 = vsyncpa [#allocation9], 0 }
   0x7   :  { %16 = vsyncpa [#allocation9 + $0x1], 0 }
   0x8   :  { %17 = vsyncpa [#allocation12], 0 }
   0x9   :  { %18 = vsyncpa [#allocation7], 0 }
   0xa   :  { %20 = vsyncpa [#allocation7 + $0x1], 0  ;;  %s2413_s21 = smov 0   ;;  %s2415_s22 = smov 0  }
   0xb   :  { %s2417_s23 = smov 0   ;;  %s2419_s24 = smov 0  }
   0xc   :  { %s2421_s25 = smov 0   ;;  %s2423_s26 = smov 0  }
   0xd LB: > { %2897 = sst [smem:[#allocation20_spill]] %s2340_s21  ;;  %s2444_s27 = sadd.s32 4294967295, %s2360_s26   ;;  %s2360_s26 = sphi %s2423_s26, %s26_s26   ;;  %s2356_s25 = sphi %s2421_s25, %s2928_s25   ;;  %s2352_s24 = sphi %s2419_s24, %s2927_s24   ;;  %s2348_s23 = sphi %s2417_s23, %s2926_s23   ;;  %s2344_s22 = sphi %s2415_s22, %s2925_s22   ;;  %s2340_s21 = sphi %s2413_s21, %s2924_s21  }
   0xe   : > { %s1687_s28 = sadd.s32 4294967294, %s2360_s26   ;;  %p60_p0 = scmp.ne.s32.totalorder %s2344_s22, %s2340_s21 }
   0xf   : > { %p2885_p1 = scmp.eq.s32.totalorder %s2444_s27, 0  ;;  %p202_p3 = scmp.eq.s32.totalorder %s1687_s28, 1 }
  0x10   : > { %p1688_p5 = scmp.ge.s32.totalorder %s2360_s26, 1  ;;  %p209_p7 = scmp.lt.s32.totalorder %s2360_s26, 3 }
  0x11   : > { %p2453_p4 = por %p2885_p1, %p60_p0  ;;  %p2458_p6 = por %p202_p3, %p60_p0 }
  0x12   : > { %p2463_p8 = pnand %p1688_p5, %p209_p7  ;;  %s2362_s8 = smov [#allocation10]  }
  0x13   : > { %s2898_s29 = scalar_select %p2453_p4, 1, 0 }
  0x14   : > { %s2899_s30 = scalar_select %p2458_p6, 1, 0 }
  0x15   : > { %s2901_s7 = scalar_select %p2463_p8, 1, 0 }
  0x16   : > { %2900 = sst [smem:[#allocation21_spill]] %s2899_s30  ;;  %s224_s9 = sshll.u32 %s2362_s8, 4  ;;  %s2467_s9 = int_to_ptr.vmem [resolvable:$true] %s224_s9 }
  0x17   : > { %p1966_p9 = pneg %p2463_p8  ;;  %s2363_s11 = smov [#allocation11]  }
  0x18   : > { %s237_s12 = sshll.u32 %s2363_s11, 4  ;;  %s2364_s13 = smov [#allocation13]   ;;  %s2478_s12 = int_to_ptr.vmem [resolvable:$true] %s237_s12 }
  0x19   : > { %p2474_p11 = pnand %p1966_p9, %p2885_p1  ;;  %s2480_s14 = sshll.u32 %s2364_s13, 4  ;;  %s251_s14 = int_to_ptr.vmem [resolvable:$true] %s2480_s14 }
  0x1a   : > { %s2903_s3 = sld [smem:[#allocation23_spill]] }
  0x1b   : > { %p2490_p13 = pneg %p2474_p11 }
  0x20   : > { %s2122_s17 = scalar_lea.hbm %s2903_s3, 512 }
  0x21   : > { %p2123_p12 = scmp.ne.s32.totalorder %s2903_s3, %s2122_s17  ;;  %p2129_p5 = scmp.lt.u32.totalorder %s2122_s17, %s2903_s3 }
  0x23   : > { %p2125_p0 = pnand %p2490_p13, %p2123_p12 }
  0x25   : > { %p2126_p3 = pneg %p2125_p0 }
  0x27   : > { %p2131_p7 = pnand %p2129_p5, %p2126_p3 }
  0x29   : > { %2134 = shalt.err (!%p2131_p7)
}
  0x2a   : > { %s2135_s11 = scalar_lea.vmem %s2467_s9, 512  ;;  %p2143_p2 = scmp.lt.s32.totalorder %s2467_s9, %s2467_s9 }
  0x2b   : > { %p2136_p9 = scmp.ne.s32.totalorder %s2467_s9, %s2135_s11  ;;  %p2144_p6 = scmp.lt.s32.totalorder %s2135_s11, %s2135_s11 }
  0x2d   : > { %p2138_p10 = pnand %p2136_p9, %p2490_p13  ;;  %p2145_p12 = por %p2144_p6, %p2143_p2 }
  0x2f   : > { %p2139_p1 = pneg %p2138_p10 }
  0x31   : > { %p2146_p0 = pnand %p2145_p12, %p2139_p1 }
  0x33   : > { %2149 = shalt.err (!%p2146_p0)
}
  0x34   : > { %s2890_s13 = smov 128   ;;  %s2892_s15 = smov 8  }
  0x35   : > { %1969 = dma.hbm_to_vmem [thread:$0]  (!%p2474_p11), %s2903_s3, 512, %s2467_s9, [#allocation9], %s2890_s13, %s2890_s13, %s2892_s15  }
  0x36   : > { %s2905_s4 = sld [smem:[#allocation24_spill]] }
  0x3c   : > { %s2150_s28 = scalar_lea.hbm %s2905_s4, 512 }
  0x3d   : > { %p2151_p1 = scmp.ne.s32.totalorder %s2905_s4, %s2150_s28  ;;  %p2157_p10 = scmp.lt.u32.totalorder %s2150_s28, %s2905_s4 }
  0x3f   : > { %p2153_p2 = pnand %p2151_p1, %p2490_p13 }
  0x41   : > { %p2154_p6 = pneg %p2153_p2 }
  0x43   : > { %p2159_p3 = pnand %p2157_p10, %p2154_p6 }
  0x45   : > { %2162 = shalt.err (!%p2159_p3)
}
  0x46   : > { %s2163_s9 = scalar_lea.vmem %s2478_s12, 512  ;;  %p2171_p12 = scmp.lt.s32.totalorder %s2478_s12, %s2478_s12 }
  0x47   : > { %p2164_p5 = scmp.ne.s32.totalorder %s2478_s12, %s2163_s9  ;;  %p2172_p0 = scmp.lt.s32.totalorder %s2163_s9, %s2163_s9 }
  0x49   : > { %p2166_p7 = pnand %p2164_p5, %p2490_p13  ;;  %p2173_p1 = por %p2172_p0, %p2171_p12 }
  0x4b   : > { %p2167_p9 = pneg %p2166_p7 }
  0x4d   : > { %p2174_p2 = pnand %p2173_p1, %p2167_p9 }
  0x4f   : > { %2177 = shalt.err (!%p2174_p2)
}
  0x50   : > { %1972 = dma.hbm_to_vmem [thread:$0]  (!%p2474_p11), %s2905_s4, 512, %s2478_s12, [#allocation12], %s2890_s13, %s2890_s13, %s2892_s15  }
  0x51   : > { %s2178_s18 = scalar_lea.hbm %s2883_s5, 512 }
  0x52   : > { %p2179_p6 = scmp.ne.s32.totalorder %s2883_s5, %s2178_s18  ;;  %p2185_p5 = scmp.lt.u32.totalorder %s2178_s18, %s2883_s5 }
  0x54   : > { %p2181_p10 = pnand %p2179_p6, %p2490_p13 }
  0x56   : > { %p2182_p3 = pneg %p2181_p10 }
  0x58   : > { %p2187_p7 = pnand %p2185_p5, %p2182_p3 }
  0x5a   : > { %2190 = shalt.err (!%p2187_p7)
}
  0x5b   : > { %s2191_s9 = scalar_lea.vmem %s251_s14, 512  ;;  %p2199_p1 = scmp.lt.s32.totalorder %s251_s14, %s251_s14 }
  0x5c   : > { %p2192_p9 = scmp.ne.s32.totalorder %s251_s14, %s2191_s9  ;;  %p2200_p2 = scmp.lt.s32.totalorder %s2191_s9, %s2191_s9 }
  0x5e   : > { %p2194_p12 = pnand %p2192_p9, %p2490_p13  ;;  %p2201_p4 = por %p2200_p2, %p2199_p1 }
  0x60   : > { %p2195_p0 = pneg %p2194_p12 }
  0x62   : > { %p2202_p8 = pnand %p2201_p4, %p2195_p0 }
  0x64   : > { %2205 = shalt.err (!%p2202_p8)
}
  0x65   : > { %1975 = dma.hbm_to_vmem [thread:$0]  (!%p2474_p11), %s2883_s5, 512, %s251_s14, [#allocation12], %s2890_s13, %s2890_s13, %s2892_s15  }
  0x66   : > { %s47_s20 = sadd.s32 1, %s2348_s23  ;;  %s38_s10 = sadd.s32 1, %s2356_s25 }
  0x67   : > { %p54_p4 = scmp.ne.s32.totalorder %s2348_s23, %s2344_s22  ;;  %p40_p8 = scmp.ge.s32.totalorder %s38_s10, 2 }
  0x68   : > { %p55_p13 = scmp.eq.s32.totalorder %s2360_s26, 0  ;;  %p2906_p6 = scmp.eq.s32.totalorder %s2444_s27, 1 }
  0x69   : > { %p1990_p3 = scmp.lt.s32.totalorder %s2360_s26, 2  ;;  %s2930_s10 = smov (%p40_p8, %s38_s10), 0 }
  0x6a   : > { %p2569_p10 = por %p2906_p6, %p54_p4  ;;  %p56_p5 = por %p55_p13, %p54_p4 }
  0x6b   : > { %s264_s16 = sand.u32 1, %s2348_s23   ;;  %s42_s17 = ssub.s32 %s2356_s25, %s2930_s10 }
  0x6c   : > { %p45_p7 = scmp.eq.s32.totalorder %s42_s17, 0  ;;  %s1693_s14 = sshll.u32 %s264_s16, 4 }
  0x6d   : > { %s1742_s18 = sshll.u32 %s2356_s25, 8  ;;  %s2908_s0 = sld [smem:[#allocation22_spill]] }
  0x6e   : > { %s2581_s19 = scalar_select %p45_p7, %s2348_s23, %s47_s20  }
  0x6f   : > { %s268_s9 = scalar_lea.vmem [#allocation5], %s1693_s14  ;;  %p2592_p11 = pnand %p1990_p3, %p56_p5 }
  0x70   : > { %s277_s12 = sshll.u32 %s268_s9, 4  ;;  %s2599_s28 = scalar_lea.hbm %s2879_s1, %s1742_s18  ;;  %s2588_s12 = int_to_ptr.vmem [resolvable:$true] %s277_s12 }
  0x71   : > { %s291_s8 = scalar_lea.vmem [#allocation8], %s1693_s14  ;;  %s2603_s15 = scalar_lea.sflag [#allocation6], %s264_s16 }
  0x72   : > { %s2601_s13 = sshll.u32 %s291_s8, 4  ;;  %p2208_p12 = pneg %p2592_p11  ;;  %s2635_s13 = int_to_ptr.vmem [resolvable:$true] %s2601_s13 }
  0x73   : > { %s2586_s11 = scalar_lea.hbm %s2908_s0, %s1742_s18  ;;  %s2211_s20 = scalar_lea.hbm %s2908_s0, 512 }
  0x74   : > { %s2206_s9 = scalar_lea.hbm %s2586_s11, 256  ;;  %p2212_p2 = scmp.lt.u32.totalorder %s2586_s11, %s2908_s0 }
  0x75   : > { %p2207_p9 = scmp.ne.s32.totalorder %s2586_s11, %s2206_s9  ;;  %p2213_p4 = scmp.lt.u32.totalorder %s2211_s20, %s2206_s9 }
  0x76   : > { %p2215_p13 = scmp.lt.u32.totalorder %s2206_s9, %s2586_s11 }
  0x77   : > { %p2209_p0 = pnand %p2208_p12, %p2207_p9  ;;  %p2214_p8 = por %p2213_p4, %p2212_p2 }
  0x79   : > { %p2210_p1 = pneg %p2209_p0  ;;  %p2216_p6 = por %p2215_p13, %p2214_p8 }
  0x7b   : > { %p2217_p3 = pnand %p2216_p6, %p2210_p1 }
  0x7d   : > { %2220 = shalt.err (!%p2217_p3)
}
  0x7e   : > { %s2221_s16 = scalar_lea.vmem %s2588_s12, 256  ;;  %s2367_s3 = smov [#allocation5]  }
  0x7f   : > { %p2222_p5 = scmp.ne.s32.totalorder %s2588_s12, %s2221_s16  ;;  %s2226_s4 = sshll.u32 %s2367_s3, 4  ;;  %s2227_s4 = int_to_ptr.vmem [resolvable:$false] %s2226_s4 }
  0x80   : > { %s2228_s14 = scalar_lea.vmem %s2227_s4, 512  ;;  %p2229_p0 = scmp.lt.s32.totalorder %s2588_s12, %s2227_s4 }
  0x81   : > { %p2224_p7 = pnand %p2222_p5, %p2208_p12  ;;  %p2230_p2 = scmp.lt.s32.totalorder %s2228_s14, %s2221_s16 }
  0x83   : > { %p2225_p9 = pneg %p2224_p7  ;;  %p2231_p4 = por %p2230_p2, %p2229_p0 }
  0x85   : > { %p2232_p8 = pnand %p2231_p4, %p2225_p9 }
  0x87   : > { %2235 = shalt.err (!%p2232_p8)
}
  0x88   : > { %s2910_s8 = smov 8   ;;  %s2911_s9 = smov 128  }
  0x89   : > { %1979 = dma.hbm_to_vmem [thread:$0]  (!%p2592_p11), %s2586_s11, 256, %s2588_s12, %s2603_s15, %s2911_s9, %s2911_s9, %s2910_s8  }
  0x8a   : > { %s287_s20 = sand.u32 1, %s2360_s26   ;;  %s2236_s18 = scalar_lea.hbm %s2599_s28, 256 }
  0x8b   : > { %s2638_s17 = scalar_lea.sflag [#allocation9], %s287_s20  ;;  %p2237_p1 = scmp.ne.s32.totalorder %s2599_s28, %s2236_s18 }
  0x8c   : > { %s2241_s4 = scalar_lea.hbm %s2879_s1, 512  ;;  %p2242_p3 = scmp.lt.u32.totalorder %s2599_s28, %s2879_s1 }
  0x8d   : > { %p2239_p13 = pnand %p2237_p1, %p2208_p12  ;;  %p2243_p5 = scmp.lt.u32.totalorder %s2241_s4, %s2236_s18 }
  0x8e   : > { %p2245_p9 = scmp.lt.u32.totalorder %s2236_s18, %s2599_s28 }
  0x8f   : > { %p2240_p6 = pneg %p2239_p13  ;;  %p2244_p7 = por %p2243_p5, %p2242_p3 }
  0x91   : > { %p2246_p0 = por %p2245_p9, %p2244_p7 }
  0x93   : > { %p2247_p2 = pnand %p2246_p0, %p2240_p6 }
  0x95   : > { %2250 = shalt.err (!%p2247_p2)
}
  0x96   : > { %s2251_s15 = scalar_lea.vmem %s2635_s13, 256  ;;  %s2368_s11 = smov [#allocation8]  }
  0x97   : > { %p2252_p4 = scmp.ne.s32.totalorder %s2635_s13, %s2251_s15  ;;  %s2256_s12 = sshll.u32 %s2368_s11, 4  ;;  %s2257_s12 = int_to_ptr.vmem [resolvable:$false] %s2256_s12 }
  0x98   : > { %s2258_s0 = scalar_lea.vmem %s2257_s12, 512  ;;  %p2259_p13 = scmp.lt.s32.totalorder %s2635_s13, %s2257_s12 }
  0x99   : > { %p2254_p8 = pnand %p2252_p4, %p2208_p12  ;;  %p2260_p3 = scmp.lt.s32.totalorder %s2258_s0, %s2251_s15 }
  0x9b   : > { %p2255_p1 = pneg %p2254_p8  ;;  %p2261_p5 = por %p2260_p3, %p2259_p13 }
  0x9d   : > { %p2262_p7 = pnand %p2261_p5, %p2255_p1 }
  0x9f   : > { %2265 = shalt.err (!%p2262_p7)
}
  0xa0   : > { %1982 = dma.hbm_to_vmem [thread:$0]  (!%p2592_p11), %s2599_s28, 256, %s2635_s13, %s2638_s17, %s2911_s9, %s2911_s9, %s2910_s8  }
  0xa1   : > { %p2912_p12 = scmp.ne.s32.totalorder %s2901_s7, 0 }
  0xa2   : > { %s2670_s20 = sand.u32 (!%p2912_p12), 1, %s2344_s22   ;;  %p2913_p6 = scmp.ne.s32.totalorder (!%p2912_p12), %s2898_s29, 0 }
  0xa3   : > { %310 = sbr.rel (%p2912_p12) target bundleno = 2280 (0x8e8), region = 44  ;;  %s2673_s18 = sshll.u32 (!%p2912_p12), %s2670_s20, 4 }
  0xa4   : > { %s313_s21 = scalar_lea.sflag (!%p2912_p12), [#allocation6], %s2670_s20  ;;  %s316_s16 = scalar_lea.vmem (!%p2912_p12), [#allocation5], %s2673_s18 }
  0xaa   : > { %2319 = dma.done.wait (%p2913_p6), %s313_s21, 256  }
  0xab   : > { %2321 = vsyncadd (%p2913_p6), %s313_s21, 4294967040  ;;  %s321_s7 = sand.u32 1, %s2444_s27   ;;  %s325_s28 = scalar_lea.vmem [#allocation8], %s2673_s18 }
  0xac   : > { %s322_s13 = scalar_lea.sflag [#allocation9], %s321_s7 }
  0xad   : > { %2323 = dma.done.wait (%p2913_p6), %s322_s13, 256  }
  0xae   : > { %2325 = vsyncadd (%p2913_p6), %s322_s13, 4294967040  ;;  %p2914_p11 = scmp.eq.s32.totalorder %s2444_s27, 0 }
  0xb0   : > { %2327 = dma.done.wait (%p2914_p11), [#allocation9], 512   ;;  %p2915_p9 = pmov %p2914_p11 }
  0xb2   : > { %2329 = vsyncadd (%p2915_p9), [#allocation9], 4294966784  ;;  %p2916_p0 = pmov %p2915_p9 }
  0xb4   : > { %2331 = dma.done.wait (%p2916_p0), [#allocation12], 1024   ;;  %p2917_p2 = pmov %p2916_p0 }
  0xb5   : > { %vm379_vm0 = vcmask 261120   ;;  %v2695_v0 = vld [vmem:[%s316_s16] sm:$0xff]  ;;  %v2697_v1 = vld [vmem:[%s316_s16 + $0x8] sm:$0xff]  ;;  %s2369_s8 = smov 96   ;;  %vm588_vm1 = vcmask 64512   ;;  %s2370_s9 = smov 112  }
  0xb6   : > { %2333 = vsyncadd (%p2917_p2), [#allocation12], 4294966272  ;;  %v375_v2 = vld [vmem:[#allocation11] sm:$0xff]  ;;  %v475_v3 = vmul.f32 %v2695_v0, %v2695_v0  ;;  %v476_v4 = vmul.f32 %v2697_v1, %v2697_v1  ;;  %v376_v5 = vld [vmem:[#allocation11 + $0x8] sm:$0xff]  ;;  %s2371_s17 = smov 120   ;;  %vm676_vm3 = vcmask 130048  }
  0xb7   : > { %v1884_v6 = vpack.c.bf16 %v376_v5, %v375_v2  ;;  %v377_v9 = vld [vmem:[#allocation11 + $0x10] sm:$0xff]  ;;  %v378_v10 = vld [vmem:[#allocation11 + $0x18] sm:$0xff]  ;;  %v501_v14 = vld [vmem:[#allocation10] sm:$0xff]  ;;  %s2372_s3 = smov 104   ;;  %s2373_s4 = smov 16   ;;  %vm1000_vm4 = vcmask 130112  }
  0xb8   : > { %v477_v7 = vsel %vm379_vm0, %v475_v3, 0.0  ;;  %v480_v8 = vsel %vm379_vm0, %v476_v4, 0.0  ;;  %v1888_v11 = vpack.c.bf16 %v378_v10, %v377_v9  ;;  %v373_v12 = vld [vmem:[%s325_s28] sm:$0xff]  ;;  %v374_v13 = vld [vmem:[%s325_s28 + $0x8] sm:$0xff]  ;;  %vm2718_vm2 = vmpackc.low %vm588_vm1, %vm588_vm1  ;;  %s2374_s14 = smov 8   ;;  %vm1219_vm5 = vcmask 195712  }
  0xb9   : > { %478 = vadd.xlane.f32.xlu0 %v477_v7  ;;  %1885 = vmatprep.subr.bf16.mxu0 %v1884_v6  ;;  %v502_v15 = vld [vmem:[#allocation10 + $0x8] sm:$0xff]  ;;  %v503_v16 = vld [vmem:[#allocation10 + $0x10] sm:$0xff]  ;;  %v504_v18 = vld [vmem:[#allocation10 + $0x18] sm:$0xff]  ;;  %s2375_s15 = smov 24   ;;  %vm1438_vm6 = vcmask 261312   ;;  %s370_s11 = scalar_lea.vmem [#allocation14], %s2673_s18 }
  0xba   : > { %1887 = vmatpush3.bf16.msra.mxu0 %v1884_v6  ;;  %1803 = vmatprep.mubr.msk.f32.mxu0 %vm379_vm0, %v373_v12  ;;  %v1892_v17 = vpack.c.bf16 %v502_v15, %v501_v14  ;;  %v1896_v19 = vpack.c.bf16 %v504_v18, %v503_v16  ;;  %v1708_v27 = vld [vmem:[%s2880_s2] ss:$0 sm:$0xff]  ;;  %s1548_s12 = sshll.u32 %s370_s11, 4  ;;  %s1744_s0 = sshll.u32 %s2352_s24, 8  ;;  %s2820_s12 = int_to_ptr.vmem [resolvable:$true] %s1548_s12 }
  0xbb   : > { %1889 = vmatprep.subr.bf16.mxu0 %v1888_v11  ;;  %s2826_s7 = scalar_lea.hbm %s2884_s6, %s1744_s0  ;;  %s1533_s24 = scalar_lea.sflag [#allocation7], %s2670_s20 }
  0xbc   : > { %1893 = vmatprep.subr.bf16.mxu1 %v1892_v17  ;;  %s2266_s18 = scalar_lea.vmem %s2820_s12, 256  ;;  %s2376_s13 = smov [#allocation14]  }
  0xbd   : > { %481 = vadd.xlane.f32.xlu0 %v480_v8  ;;  %1895 = vmatpush3.bf16.msra.mxu1 %v1892_v17  ;;  %p2267_p4 = scmp.ne.s32.totalorder %s2820_s12, %s2266_s18  ;;  %s2270_s28 = sshll.u32 %s2376_s13, 4  ;;  %s2271_s28 = int_to_ptr.vmem [resolvable:$false] %s2270_s28 }
  0xbe   : > { %1891 = vmatpush3.bf16.msra.mxu0 %v1888_v11  ;;  %1897 = vmatprep.subr.bf16.mxu1 %v1896_v19  ;;  %s2272_s27 = scalar_lea.vmem %s2271_s28, 512  ;;  %p2273_p13 = scmp.lt.s32.totalorder %s2820_s12, %s2271_s28 }
  0xbf   : > { %p2268_p8 = pnand %p2267_p4, %p2569_p10  ;;  %p2274_p3 = scmp.lt.s32.totalorder %s2272_s27, %s2266_s18 }
  0xc1   : > { %1804 = vmatmul.mubr.msk.f32.vlgmr.msra.gmra.mrb[0].mxu0 %vm379_vm0, %v374_v13  ;;  %1899 = vmatpush3.bf16.msra.mxu1 %v1896_v19  ;;  %p2269_p1 = pneg %p2268_p8  ;;  %p2275_p5 = por %p2274_p3, %p2273_p13 }
  0xc3   : > { %p2276_p7 = pnand %p2275_p5, %p2269_p1 }
 0x146   : > { %v479_v20 = vpop.xlane.xlu0 %478 }
 0x147   : > { %v484_v21 = vmul.f32 0.03125, %v479_v20 }
 0x149   : > { %v486_v22 = vadd.f32 1e-06, %v484_v21 }
 0x14a   : > { %v482_v23 = vpop.xlane.xlu0 %481 }
 0x14b   : > { %2086 = vrsqrt.f32 %v486_v22  ;;  %v485_v24 = vmul.f32 0.03125, %v482_v23 }
 0x14d   : > { %v487_v25 = vadd.f32 1e-06, %v485_v24 }
 0x14f   : > { %2088 = vrsqrt.f32 %v487_v25 }
 0x155   : > { %v2087_v26 = vpop.eup %2086 }
 0x156   : > { %v490_v28 = vmul.f32 %v2087_v26, %v2695_v0 }
 0x158   : > { %v499_v29 = vmul.f32 %v1708_v27, %v490_v28 }
 0x159   : > { %v2089_v30 = vpop.eup %2088 }
 0x15a   : > { %v491_v31 = vmul.f32 %v2089_v30, %v2697_v1  ;;  %1814 = vmatprep.mubr.msk.f32.mxu1 %vm379_vm0, %v499_v29 }
 0x15c   : > { %v500_v32 = vmul.f32 %v1708_v27, %v491_v31 }
 0x15e   : > { %1815 = vmatmul.mubr.msk.f32.vlgmr.msra.gmra.mrb[0].mxu1 %vm379_vm0, %v500_v32 }
 0x194   : > { %v1805_v33 = vpop.f32.mrb[0].mxu0 }
 0x195   : > { %462 = vst.msk [vmem:[#allocation2 + $0x8] sm:$0xff] %vm379_vm0, %v1805_v33  ;;  %v452_v34 = vpop.f32.mrb[1].mxu0  ;;  %467 = vrot.lane.b32.xlu1 %v1805_v33, %s2369_s8 }
 0x196   : > { %461 = vst.msk [vmem:[#allocation2] sm:$0xff] %vm379_vm0, %v452_v34  ;;  %465 = vrot.lane.b32.xlu0 %v452_v34, %s2369_s8 }
 0x19c   : > { %v1004_v35 = vld [vmem:[#allocation2 + $0x8] sm:$0xff] }
 0x19d   : > { %v1003_v36 = vld [vmem:[#allocation2] sm:$0xff] }
 0x19e   : > { %v2722_v38 = vpack.i.bf16 %v1004_v35, %v1003_v36  ;;  %v1900_v39 = vpack.c.bf16 %v1004_v35, %v1003_v36 }
 0x1a0   : > { %2062 = vrot.lane.b32.xlu0 %v2722_v38, %s2370_s9  ;;  %1902 = vmatprep.subr.msk.bf16.mxu0 %vm2718_vm2, %v1900_v39 }
 0x1a1   : > { %2057 = vrot.lane.b32.xlu1 %v2722_v38, %s2371_s17  ;;  %1905 = vmatpush3.bf16.xpose.msk.msra.mxu0 %vm2718_vm2, %v1900_v39 }
 0x207   : > { %v468_v40 = vpop.permute.xlu1 %467 }
 0x208   : > { %472 = vst.msk [vmem:[#allocation3 + $0x8] sm:$0xff] %vm379_vm0, %v468_v40  ;;  %v466_v41 = vpop.permute.xlu0 %465 }
 0x209   : > { %471 = vst.msk [vmem:[#allocation3] sm:$0xff] %vm379_vm0, %v466_v41 }
 0x20f   : > { %v696_v42 = vld [vmem:[#allocation3 + $0x8] sm:$0xff] }
 0x210   : > { %v695_v43 = vld [vmem:[#allocation3] sm:$0xff] }
 0x211   : > { %v1906_v44 = vpack.c.bf16 %v696_v42, %v695_v43  ;;  %v2734_v49 = vpack.i.bf16 %v696_v42, %v695_v43 }
 0x212   : > { %v2063_v45 = vpop.permute.xlu0 %2062 }
 0x213   : > { %v2065_v46 = vunpack.i.h.bf16 %v2063_v45  ;;  %v2064_v47 = vunpack.i.l.bf16 %v2063_v45  ;;  %1907 = vmatprep.subr.bf16.mxu1 %v1906_v44  ;;  %v2058_v48 = vpop.permute.xlu1 %2057 }
 0x214   : > { %v2060_v50 = vunpack.i.h.bf16 %v2058_v48  ;;  %v2059_v51 = vunpack.i.l.bf16 %v2058_v48  ;;  %1909 = vmatpush3.bf16.msra.mxu1 %v1906_v44 }
 0x215   : > { %v1920_v52 = vpack.c.bf16 %v2065_v46, %v2064_v47 }
 0x216   : > { %v1910_v53 = vpack.c.bf16 %v2060_v50, %v2059_v51 }
 0x217   : > { %1922 = vmatprep.subr.msk.bf16.mxu0 %vm2718_vm2, %v1920_v52 }
 0x218   : > { %1912 = vmatprep.subr.msk.bf16.mxu1 %vm2718_vm2, %v1910_v53 }
 0x231   : > { %v1816_v54 = vpop.f32.mrb[0].mxu1 }
 0x232   : > { %v577_v55 = vpop.f32.mrb[1].mxu1 }
 0x233   : > { %1821 = vmatprep.mubr.msk.f32.mxu0 %vm588_vm1, %v577_v55  ;;  %1005 = vrot.lane.b32.xlu0 %v577_v55, %s2370_s9 }
 0x234   : > { %1822 = vmatmul.mubr.msk.f32.vlgmr.msra.gmra.mrb[2].mxu0 %vm588_vm1, %v1816_v54 }
 0x235   : > { %1925 = vmatpush3.bf16.xpose.msk.msra.mxu0 %vm2718_vm2, %v1920_v52 }
 0x2a5   : > { %v1006_v56 = vpop.permute.xlu0 %1005 }
 0x2a6   : > { %1849 = vmatprep.mubr.msk.f32.mxu0 %vm588_vm1, %v1006_v56 }
 0x307   : > { %v1823_v57 = vpop.f32.mrb[2].mxu0 }
 0x308   : > { %v667_v58 = vpop.f32.mrb[3].mxu0  ;;  %v680_v59 = vsel %vm676_vm3, %v1823_v57, -inf }
 0x309   : > { %681 = vmax.xlane.f32.xlu1 %v680_v59  ;;  %v677_v60 = vsel %vm676_vm3, %v667_v58, -inf }
 0x30d   : > { %678 = vmax.xlane.f32.xlu1 %v677_v60 }
 0x31e   : > { %786 = vrot.lane.b32.xlu1 %v577_v55, %s2371_s17 }
 0x322   : > { %788 = vrot.lane.b32.xlu1 %v1816_v54, %s2371_s17 }
 0x326   : > { %1007 = vrot.lane.b32.xlu1 %v1816_v54, %s2370_s9 }
 0x396   : > { %v682_v61 = vpop.xlane.xlu1 %681 }
 0x397   : > { %v684_v62 = vsub.f32 %v1823_v57, %v682_v61 }
 0x399   : > { %v687_v3 = vmul.f32 1.442695, %v684_v62 }
 0x39a   : > { %v679_v63 = vpop.xlane.xlu1 %678 }
 0x39b   : > { %v683_v2 = vsub.f32 %v667_v58, %v679_v63 }
 0x39d   : > { %v685_v4 = vmul.f32 1.442695, %v683_v2 }
 0x39e   : > { %v787_v5 = vpop.permute.xlu1 %786 }
 0x39f   : > { %2090 = vpow2.f32 %v685_v4 }
 0x3a0   : > { %2092 = vpow2.f32 %v687_v3 }
 0x3a2   : > { %v789_v6 = vpop.permute.xlu1 %788 }
 0x3a6   : > { %v1008_v7 = vpop.permute.xlu1 %1007 }
 0x3a7   : > { %1850 = vmatmul.mubr.msk.f32.vlgmr.msra.gmra.mrb[4].mxu0 %vm588_vm1, %v1008_v7 }
 0x3a9   : > { %v2752_v8 = vpop.eup %2090 }
 0x3aa   : > { %v2754_v9 = vpop.eup %2092  ;;  %1828 = vmatprep.mubr.msk.f32.mxu1 %vm676_vm3, %v2752_v8 }
 0x3ab   : > { %1829 = vmatmul.mubr.msk.f32.vlgmr.msra.gmra.mrb[2].mxu1 %vm676_vm3, %v2754_v9 }
 0x3ac   : > { %1915 = vmatpush3.bf16.xpose.msk.msra.mxu1 %vm2718_vm2, %v1910_v53  ;;  %1835 = vmatprep.mubr.msk.f32.mxu1 %vm588_vm1, %v787_v5 }
 0x3b3   : > { %1836 = vmatmul.mubr.msk.f32.vlgmr.msra.gmra.mrb[4].mxu1 %vm588_vm1, %v789_v6 }
 0x47a   : > { %v1851_v10 = vpop.f32.mrb[4].mxu0 }
 0x47b   : > { %v1089_v11 = vpop.f32.mrb[5].mxu0  ;;  %v1101_v12 = vsel %vm676_vm3, %v1851_v10, -inf }
 0x47c   : > { %1102 = vmax.xlane.f32.xlu0 %v1101_v12  ;;  %v1098_v15 = vsel %vm676_vm3, %v1089_v11, -inf }
 0x47e   : > { %v2765_v13 = vpop.f32.mrb[2].mxu1 }
 0x47f   : > { %v2767_v14 = vpop.f32.mrb[3].mxu1 }
 0x480   : > { %1099 = vmax.xlane.f32.xlu0 %v1098_v15 }
 0x486   : > { %v1837_v16 = vpop.f32.mrb[4].mxu1 }
 0x487   : > { %v870_v17 = vpop.f32.mrb[5].mxu1  ;;  %v882_v18 = vsel %vm676_vm3, %v1837_v16, -inf }
 0x488   : > { %883 = vmax.xlane.f32.xlu1 %v882_v18  ;;  %v879_v19 = vsel %vm676_vm3, %v870_v17, -inf }
 0x489   : > { %880 = vmax.xlane.f32.xlu0 %v879_v19 }
 0x499   : > { %2072 = vrot.lane.b32.xlu1 %v2734_v49, %s2370_s9 }
 0x49d   : > { %2077 = vrot.lane.b32.xlu1 %v2722_v38, %s2372_s3 }
 0x49f   : > { %2067 = vrot.lane.b32.xlu0 %v2734_v49, %s2371_s17 }
 0x4a1   : > { %1224 = vrot.lane.b32.xlu1 %v577_v55, %s2372_s3 }
 0x4a3   : > { %1226 = vrot.lane.b32.xlu0 %v1816_v54, %s2372_s3 }
 0x509   : > { %v1103_v20 = vpop.xlane.xlu0 %1102 }
 0x50a   : > { %v1105_v27 = vsub.f32 %v1851_v10, %v1103_v20 }
 0x50c   : > { %v1108_v38 = vmul.f32 1.442695, %v1105_v27 }
 0x50d   : > { %v1100_v21 = vpop.xlane.xlu0 %1099 }
 0x50e   : > { %v1104_v22 = vsub.f32 %v1089_v11, %v1100_v21  ;;  %v689_v21 = vsel %vm676_vm3, %v2752_v8, 0.0 }
 0x510   : > { %v1106_v29 = vmul.f32 1.442695, %v1104_v22  ;;  %v692_v22 = vsel %vm676_vm3, %v2754_v9, 0.0 }
 0x515   : > { %v884_v23 = vpop.xlane.xlu1 %883 }
 0x516   : > { %v886_v24 = vsub.f32 %v1837_v16, %v884_v23  ;;  %v881_v25 = vpop.xlane.xlu0 %880 }
 0x517   : > { %v885_v26 = vsub.f32 %v870_v17, %v881_v25 }
 0x518   : > { %v889_v28 = vmul.f32 1.442695, %v886_v24 }
 0x519   : > { %v887_v30 = vmul.f32 1.442695, %v885_v26  ;;  %v2073_v31 = vpop.permute.xlu1 %2072 }
 0x51a   : > { %v2075_v32 = vunpack.i.h.bf16 %v2073_v31  ;;  %v2068_v33 = vpop.permute.xlu0 %2067  ;;  %v2074_v34 = vunpack.i.l.bf16 %v2073_v31 }
 0x51b   : > { %2094 = vpow2.f32 %v887_v30  ;;  %v2070_v35 = vunpack.i.h.bf16 %v2068_v33  ;;  %v2069_v36 = vunpack.i.l.bf16 %v2068_v33 }
 0x51c   : > { %2096 = vpow2.f32 %v889_v28  ;;  %v1926_v40 = vpack.c.bf16 %v2075_v32, %v2074_v34 }
 0x51d   : > { %2098 = vpow2.f32 %v1106_v29  ;;  %v1916_v39 = vpack.c.bf16 %v2070_v35, %v2069_v36  ;;  %v2078_v41 = vpop.permute.xlu1 %2077 }
 0x51e   : > { %2100 = vpow2.f32 %v1108_v38  ;;  %v2080_v42 = vunpack.i.h.bf16 %v2078_v41  ;;  %v2079_v43 = vunpack.i.l.bf16 %v2078_v41  ;;  %v1227_v51 = vpop.permute.xlu0 %1226 }
 0x51f   : > { %1917 = vmatprep.subr.bf16.mxu1 %v1916_v39 }
 0x520   : > { %1919 = vmatpush3.bf16.msra.mxu1 %v1916_v39  ;;  %v1930_v47 = vpack.c.bf16 %v2080_v42, %v2079_v43  ;;  %v1443_v43 = vld [vmem:[#allocation13] sm:$0xff] }
 0x521   : > { %1927 = vmatprep.subr.bf16.mxu1 %v1926_v40  ;;  %v1225_v50 = vpop.permute.xlu1 %1224 }
 0x525   : > { %v2095_v44 = vpop.eup %2094 }
 0x526   : > { %v2097_v45 = vpop.eup %2096  ;;  %1842 = vmatprep.mubr.msk.f32.mxu1 %vm676_vm3, %v2095_v44  ;;  %v891_v60 = vsel %vm676_vm3, %v2095_v44, 0.0  ;;  %v1444_v44 = vld [vmem:[#allocation13 + $0x8] sm:$0xff] }
 0x527   : > { %v2099_v46 = vpop.eup %2098  ;;  %1843 = vmatmul.mubr.msk.f32.vlgmr.msra.gmra.mrb[6].mxu1 %vm676_vm3, %v2097_v45  ;;  %v894_v37 = vsel %vm676_vm3, %v2097_v45, 0.0  ;;  %v1445_v45 = vld [vmem:[#allocation13 + $0x10] sm:$0xff] }
 0x528   : > { %1929 = vmatpush3.bf16.msra.mxu1 %v1926_v40  ;;  %1856 = vmatprep.mubr.msk.f32.mxu1 %vm676_vm3, %v2099_v46  ;;  %v2101_v48 = vpop.eup %2100  ;;  %v1110_v61 = vsel %vm676_vm3, %v2099_v46, 0.0  ;;  %v1446_v46 = vld [vmem:[#allocation13 + $0x18] sm:$0xff] }
 0x529   : > { %1932 = vmatprep.subr.msk.bf16.mxu1 %vm2718_vm2, %v1930_v47  ;;  %v1113_v62 = vsel %vm676_vm3, %v2101_v48, 0.0 }
 0x52b   : > { %1857 = vmatmul.mubr.msk.f32.vlgmr.msra.gmra.mrb[8].mxu1 %vm676_vm3, %v2101_v48 }
 0x52c   : > { %1863 = vmatprep.mubr.msk.f32.mxu1 %vm588_vm1, %v1225_v50 }
 0x531   : > { %1935 = vmatpush3.bf16.xpose.msk.msra.mxu1 %vm2718_vm2, %v1930_v47  ;;  %v1944_v47 = vpack.c.bf16 %v1446_v46, %v1445_v45 }
 0x538   : > { %1864 = vmatmul.mubr.msk.f32.vlgmr.msra.gmra.mrb[10].mxu1 %vm588_vm1, %v1227_v51 }
 0x5fa   : > { %v1844_v52 = vpop.f32.mrb[6].mxu1 }
 0x5fb   : > { %v979_v53 = vpop.f32.mrb[7].mxu1 }
 0x5fe   : > { %v2790_v54 = vpop.f32.mrb[8].mxu1 }
 0x5ff   : > { %v1198_v55 = vpop.f32.mrb[9].mxu1 }
 0x60b   : > { %v1865_v56 = vpop.f32.mrb[10].mxu1 }
 0x60c   : > { %v1308_v57 = vpop.f32.mrb[11].mxu1  ;;  %v1320_v58 = vsel %vm676_vm3, %v1865_v56, -inf }
 0x60d   : > { %1321 = vmax.xlane.f32.xlu0 %v1320_v58  ;;  %v1317_v59 = vsel %vm676_vm3, %v1308_v57, -inf }
 0x60e   : > { %1318 = vmax.xlane.f32.xlu1 %v1317_v59 }
 0x612   : > { %892 = vadd.xlane.f32.xlu1 %v891_v60 }
 0x616   : > { %895 = vadd.xlane.f32.xlu1 %v894_v37 }
 0x61a   : > { %1111 = vadd.xlane.f32.xlu1 %v1110_v61 }
 0x61e   : > { %1114 = vadd.xlane.f32.xlu1 %v1113_v62 }
 0x623   : > { %2082 = vrot.lane.b32.xlu0 %v2734_v49, %s2372_s3 }
 0x69a   : > { %v1322_v63 = vpop.xlane.xlu0 %1321 }
 0x69b   : > { %v1324_v2 = vsub.f32 %v1865_v56, %v1322_v63  ;;  %v1319_v3 = vpop.xlane.xlu1 %1318 }
 0x69c   : > { %v1323_v4 = vsub.f32 %v1308_v57, %v1319_v3 }
 0x69d   : > { %v1327_v5 = vmul.f32 1.442695, %v1324_v2 }
 0x69e   : > { %v1325_v6 = vmul.f32 1.442695, %v1323_v4  ;;  %v2083_v7 = vpop.permute.xlu0 %2082 }
 0x69f   : > { %2102 = vpow2.f32 %v1327_v5  ;;  %v2085_v10 = vunpack.i.h.bf16 %v2083_v7  ;;  %v2084_v11 = vunpack.i.l.bf16 %v2083_v7  ;;  %v893_v15 = vpop.xlane.xlu1 %892 }
 0x6a0   : > { %2104 = vpow2.f32 %v1325_v6 }
 0x6a1   : > { %v1936_v12 = vpack.c.bf16 %v2085_v10, %v2084_v11 }
 0x6a3   : > { %1937 = vmatprep.subr.bf16.mxu0 %v1936_v12  ;;  %v896_v17 = vpop.xlane.xlu1 %895 }
 0x6a4   : > { %1939 = vmatpush3.bf16.msra.mxu0 %v1936_v12 }
 0x6a7   : > { %v1112_v20 = vpop.xlane.xlu1 %1111 }
 0x6a8   : > { %2106 = vrcp.f32 %v1112_v20 }
 0x6a9   : > { %v2103_v16 = vpop.eup %2102  ;;  %2108 = vrcp.f32 %v893_v15 }
 0x6aa   : > { %v2105_v18 = vpop.eup %2104  ;;  %v1332_v49 = vsel %vm676_vm3, %v2103_v16, 0.0  ;;  %2110 = vrcp.f32 %v896_v17 }
 0x6ab   : > { %1333 = vadd.xlane.f32.xlu0 %v1332_v49  ;;  %1870 = vmatprep.mubr.msk.f32.mxu0 %vm676_vm3, %v2105_v18  ;;  %v1329_v19 = vsel %vm676_vm3, %v2105_v18, 0.0  ;;  %v1115_v23 = vpop.xlane.xlu1 %1114 }
 0x6ac   : > { %1871 = vmatmul.mubr.msk.f32.vlgmr.msra.gmra.mrb[6].mxu0 %vm676_vm3, %v2103_v16  ;;  %1330 = vadd.xlane.f32.xlu1 %v1329_v19  ;;  %2112 = vrcp.f32 %v1115_v23 }
 0x6b0   : > { %690 = vadd.xlane.f32.xlu1 %v689_v21 }
 0x6b2   : > { %v2107_v24 = vpop.eup %2106 }
 0x6b3   : > { %v1209_v25 = vmul.f32 %v2107_v24, %v1198_v55  ;;  %v2109_v26 = vpop.eup %2108 }
 0x6b4   : > { %693 = vadd.xlane.f32.xlu1 %v692_v22  ;;  %v990_v27 = vmul.f32 %v2109_v26, %v979_v53  ;;  %v2111_v28 = vpop.eup %2110 }
 0x6b5   : > { %v991_v8 = vmul.f32 %v2111_v28, %v1844_v52 }
 0x6b6   : > { %v2113_v29 = vpop.eup %2112 }
 0x6b7   : > { %v1210_v9 = vmul.f32 %v2113_v29, %v2790_v54 }
 0x6c1   : > { %1213 = vrot.lane.b32.xlu0 %v1209_v25, %s2373_s4 }
 0x6c5   : > { %994 = vrot.lane.b32.xlu1 %v990_v27, %s2374_s14 }
 0x6c9   : > { %996 = vrot.lane.b32.xlu1 %v991_v8, %s2374_s14 }
 0x6cd   : > { %1215 = vrot.lane.b32.xlu1 %v1210_v9, %s2373_s4 }
 0x738   : > { %v1334_v34 = vpop.xlane.xlu0 %1333 }
 0x739   : > { %v1331_v30 = vpop.xlane.xlu1 %1330 }
 0x73c   : > { %v1214_v40 = vpop.permute.xlu0 %1213 }
 0x73d   : > { %v691_v31 = vpop.xlane.xlu1 %690 }
 0x73e   : > { %2114 = vrcp.f32 %v691_v31 }
 0x741   : > { %v694_v32 = vpop.xlane.xlu1 %693 }
 0x742   : > { %2116 = vrcp.f32 %v694_v32 }
 0x743   : > { %2118 = vrcp.f32 %v1331_v30 }
 0x744   : > { %2120 = vrcp.f32 %v1334_v34 }
 0x745   : > { %v995_v33 = vpop.permute.xlu1 %994 }
 0x748   : > { %v2115_v35 = vpop.eup %2114 }
 0x749   : > { %v780_v36 = vmul.f32 %v2115_v35, %v2767_v14  ;;  %v997_v38 = vpop.permute.xlu1 %996  ;;  %v1940_v14 = vpack.c.bf16 %v1444_v44, %v1443_v43 }
 0x74b   : > { %782 = vst.msk [vmem:[#allocation4] sm:$0xff] %vm588_vm1, %v780_v36  ;;  %1941 = vmatprep.subr.bf16.mxu0 %v1940_v14 }
 0x74c   : > { %v2117_v39 = vpop.eup %2116  ;;  %1001 = vst.msk [vmem:[#allocation4] sm:$0xff] %vm1000_vm4, %v995_v33  ;;  %1943 = vmatpush3.bf16.msra.mxu0 %v1940_v14 }
 0x74d   : > { %v781_v41 = vmul.f32 %v2117_v39, %v2765_v13  ;;  %1220 = vst.msk [vmem:[#allocation4] sm:$0xff] %vm1219_vm5, %v1214_v40  ;;  %v1216_v42 = vpop.permute.xlu1 %1215  ;;  %1945 = vmatprep.subr.bf16.mxu0 %v1944_v47  ;;  %v2119_v50 = vpop.eup %2118 }
 0x74e   : > { %v2121_v52 = vpop.eup %2120 }
 0x74f   : > { %783 = vst.msk [vmem:[#allocation4 + $0x8] sm:$0xff] %vm588_vm1, %v781_v41 }
 0x750   : > { %1002 = vst.msk [vmem:[#allocation4 + $0x8] sm:$0xff] %vm1000_vm4, %v997_v38  ;;  %1947 = vmatpush3.bf16.msra.mxu0 %v1944_v47 }
 0x751   : > { %1221 = vst.msk [vmem:[#allocation4 + $0x8] sm:$0xff] %vm1219_vm5, %v1216_v42 }
 0x77f   : > { %v1872_v48 = vpop.f32.mrb[6].mxu0 }
 0x780   : > { %v1417_v13 = vpop.f32.mrb[7].mxu0  ;;  %v1429_v53 = vmul.f32 %v2121_v52, %v1872_v48 }
 0x781   : > { %v1428_v51 = vmul.f32 %v2119_v50, %v1417_v13 }
 0x783   : > { %1432 = vrot.lane.b32.xlu1 %v1428_v51, %s2375_s15 }
 0x787   : > { %1434 = vrot.lane.b32.xlu1 %v1429_v53, %s2375_s15 }
 0x7f5   : > { %v1433_v54 = vpop.permute.xlu1 %1432 }
 0x7f6   : > { %1439 = vst.msk [vmem:[#allocation4] sm:$0xff] %vm1438_vm6, %v1433_v54 }
 0x7f9   : > { %v1435_v55 = vpop.permute.xlu1 %1434 }
 0x7fa   : > { %1440 = vst.msk [vmem:[#allocation4 + $0x8] sm:$0xff] %vm1438_vm6, %v1435_v55 }
 0x7fd   : > { %v1441_v56 = vld [vmem:[#allocation4] sm:$0xff] }
 0x7fe   : > { %1881 = vmatprep.mubr.msk.f32.mxu0 %vm379_vm0, %v1441_v56 }
 0x801   : > { %v1442_v57 = vld [vmem:[#allocation4 + $0x8] sm:$0xff] }
 0x802   : > { %1882 = vmatmul.mubr.msk.f32.vlgmr.msra.gmra.mrb[8].mxu0 %vm379_vm0, %v1442_v57 }
 0x8d5   : > { %v1883_v58 = vpop.f32.mrb[8].mxu0 }
 0x8d6   : > { %v1529_v59 = vadd.f32 %v1883_v58, %v2697_v1  ;;  %v1519_v60 = vpop.f32.mrb[9].mxu0 }
 0x8d7   : > { %v1528_v37 = vadd.f32 %v1519_v60, %v2695_v0 }
 0x8d8   : > { %1531 = vst.msk [vmem:[%s370_s11 + $0x8] sm:$0xff] %vm379_vm0, %v1529_v59 }
 0x8d9   : > { %1530 = vst.msk [vmem:[%s370_s11] sm:$0xff] %vm379_vm0, %v1528_v37 }
 0x8da   : > { %2279 = shalt.err (!%p2276_p7)
}
 0x8db   : > { %s2280_s29 = scalar_lea.hbm %s2826_s7, 256  ;;  %s2284_s17 = scalar_lea.hbm %s2884_s6, 512 }
 0x8dc   : > { %p2281_p12 = scmp.ne.s32.totalorder %s2826_s7, %s2280_s29  ;;  %p2285_p9 = scmp.lt.u32.totalorder %s2826_s7, %s2884_s6 }
 0x8dd   : > { %p2286_p0 = scmp.lt.u32.totalorder %s2284_s17, %s2280_s29  ;;  %p2288_p4 = scmp.lt.u32.totalorder %s2280_s29, %s2826_s7 }
 0x8de   : > { %p2282_p6 = pnand %p2281_p12, %p2569_p10 }
 0x8df   : > { %p2287_p2 = por %p2286_p0, %p2285_p9 }
 0x8e0   : > { %p2283_p11 = pneg %p2282_p6 }
 0x8e1   : > { %p2289_p8 = por %p2288_p4, %p2287_p2 }
 0x8e3   : > { %p2290_p1 = pnand %p2289_p8, %p2283_p11 }
 0x8e5   : > { %2293 = shalt.err (!%p2290_p1)
}
 0x8e6   : > { %s2377_s15 = smov 128  }
 0x8e7   : > { %1964 = dma.vmem_to_hbm [thread:$0]  (%p2569_p10), %s2820_s12, 256, %s2826_s7, %s1533_s24, %s2377_s15, %s2377_s15, %s2374_s14  }
 0x8e8 PF: > { %s2920_s11 = sld [smem:[#allocation20_spill]]  ;;  %s2921_s0 = sld [smem:[#allocation21_spill]] }
 0x8e9   : > { %p2923_p3 = scmp.ge.s32.totalorder %s2360_s26, 2 }
 0x8ee   : > { %s1563_s21 = sand.u32 1, %s2920_s11   ;;  %p2922_p13 = scmp.ne.s32.totalorder %s2921_s0, 0 }
 0x8ef   : > { %s1564_s16 = scalar_lea.sflag [#allocation7], %s1563_s21 }
 0x8f0   : > { %p1984_p5 = pnand %p2923_p3, %p2922_p13 }
 0x8f2   : > { %2335 = dma.done.wait (!%p1984_p5), %s1564_s16, 256  }
 0x8f3   : > { %2337 = vsyncadd (!%p1984_p5), %s1564_s16, 4294967040  ;;  %s26_s26 = sadd.s32 1, %s2360_s26   ;;  %s2924_s21 = smov %s2344_s22 }
 0x8f4   : > { %p23_p7 = scmp.ge.s32.totalorder %s26_s26, 4   ;;  %s2925_s22 = smov %s2348_s23 }
 0x8f5   : > { %s2926_s23 = smov %s2581_s19  ;;  %s2927_s24 = smov %s2356_s25 }
 0x8f6   : > { %s2928_s25 = smov %s2930_s10  ;;  %25 = sbr.rel (!%p23_p7) target bundleno = 13 (0xd), region = 114 }
 0x8fd   :  { %1569 = vsyncpa [#allocation6], 1 }
 0x8fe   :  { %1571 = vsyncpa [#allocation6 + $0x1], 1 }
 0x8ff   :  { %1572 = vsyncpa [#allocation9], 1 }
 0x900   :  { %1574 = vsyncpa [#allocation9 + $0x1], 1 }
 0x901   :  { %1575 = vsyncpa [#allocation12], 1 }
 0x902   :  { %1576 = vsyncpa [#allocation7], 1 }
 0x903   :  { %1578 = vsyncpa [#allocation7 + $0x1], 1 }

</bundles_post_ra>
